<compile_context>
chip_gen: v7x
topology: tpu7x:2x2x1
jax: 0.10.0
libtpu: 0.0.40
codegen_flags: <defaults>
</compile_context>

<pallas_src>
import functools

import jax
import jax.numpy as jnp
from jax.experimental import pallas as pl
from jax.experimental.pallas import tpu as pltpu


def _pick_row_tile(M, candidates=(256, 128, 64, 32, 16, 8)):
    """Largest row-tile from `candidates` that divides M (falls back to M)."""
    for t in candidates:
        if t <= M and M % t == 0:
            return t
    return M


# ----------------------------------------------------------------------------
# Small capability / sizing helpers (kept robust: failures fall back to safe
# defaults so the kernel always compiles and runs).
# ----------------------------------------------------------------------------
_VMEM_LIMIT = "unset"


def _vmem_limit_bytes():
    """~3/4 of physical VMEM (capped at 100 MiB), or None if unqueryable."""
    global _VMEM_LIMIT
    if _VMEM_LIMIT == "unset":
        try:
            cap = pltpu.get_tpu_info().vmem_capacity_bytes
            _VMEM_LIMIT = min((int(cap) * 3) // 4, 100 * 1024 * 1024)
        except Exception:
            _VMEM_LIMIT = None
    return _VMEM_LIMIT


def _mosaic_params(dims):
    kw = dict(dimension_semantics=dims)
    lim = _vmem_limit_bytes()
    if lim is not None:
        kw["vmem_limit_bytes"] = lim
    return pltpu.CompilerParams(**kw)


_SINGLE_BUF = None


def _single_buffer_supported():
    """Probe once whether pipeline_mode=pl.Buffered(1) compiles/runs."""
    global _SINGLE_BUF
    if _SINGLE_BUF is not None:
        return _SINGLE_BUF
    try:
        def _k(x_ref, o_ref):
            o_ref[...] = x_ref[...] + 1.0

        spec = pl.BlockSpec((8, 128), lambda i: (0, 0),
                            pipeline_mode=pl.Buffered(1))
        out = pl.pallas_call(
            _k,
            out_shape=jax.ShapeDtypeStruct((8, 128), jnp.float32),
            grid=(2,),
            in_specs=[spec],
            out_specs=pl.BlockSpec((8, 128), lambda i: (0, 0)),
        )(jnp.zeros((8, 128), jnp.float32))
        jax.block_until_ready(out)
        _SINGLE_BUF = True
    except Exception:
        _SINGLE_BUF = False
    return _SINGLE_BUF


def _const_spec(shape):
    """BlockSpec for a grid-invariant operand (single-buffered if supported)."""
    idx = lambda *_: (0,) * len(shape)
    if _single_buffer_supported():
        return pl.BlockSpec(shape, idx, pipeline_mode=pl.Buffered(1))
    return pl.BlockSpec(shape, idx)


# ----------------------------------------------------------------------------
# Fused encoder attention sub-block (one q-tile per grid step):
#   QKV projection (head-major weights, in-kernel) + scaled-dot attention
#   + out-projection + residual + LayerNorm.
#
# Grid = (B, S // tq); K/V for the current batch are computed once at qt == 0
# into VMEM scratch and reused for all q-tiles of that batch.
# ----------------------------------------------------------------------------
def _attn_layer_kernel(xf_ref, xq_ref, bias_ref,
                       wq_ref, wk_ref, wv_ref, bq_ref, bk_ref, bv_ref,
                       wo_ref, bo_ref, g_ref, bt_ref,
                       o_ref, k_sc, v_sc, ctx_sc, *, n_heads, scale, eps):
    qt = pl.program_id(1)
    S = xf_ref.shape[1]
    H = xf_ref.shape[2]
    dH = H // n_heads
    tq = xq_ref.shape[1]

    # Recompute K/V for this batch only on the first q-tile (q-tile axis is
    # innermost and marked "arbitrary"; scratch persists across grid steps).
    @pl.when(qt == 0)
    def _():
        x_full = xf_ref[0]                                    # (S, H) bf16
        for h in range(n_heads):
            kh = jnp.dot(x_full, wk_ref[h],
                         preferred_element_type=jnp.float32) + bk_ref[h]
            vh = jnp.dot(x_full, wv_ref[h],
                         preferred_element_type=jnp.float32) + bv_ref[h]
            k_sc[h] = kh.astype(k_sc.dtype)
            v_sc[h] = vh.astype(v_sc.dtype)

    xq = xq_ref[0]                                            # (tq, H) bf16
    # Hoist the mask-bias broadcast out of the head loop (no CSE in JAX).
    bias_q = jnp.broadcast_to(bias_ref[0], (tq, S))           # (tq, S) f32

    # Per-head attention; PV results go to a VMEM scratch at their head offset
    # so the out-projection is a single full-depth matmul afterwards.
    for h in range(n_heads):
        qh = jnp.dot(xq, wq_ref[h],
                     preferred_element_type=jnp.float32) + bq_ref[h]
        s = jax.lax.dot_general(qh.astype(jnp.bfloat16), k_sc[h],
                                (((1,), (1,)), ((), ())),
                                preferred_element_type=jnp.float32)
        s = s * scale + bias_q
        s = s - jnp.max(s, axis=-1, keepdims=True)
        p = jnp.exp(s)
        p = p * pl.reciprocal(jnp.sum(p, axis=-1, keepdims=True), approx=True)
        oh = jnp.dot(p.astype(jnp.bfloat16), v_sc[h],
                     preferred_element_type=jnp.float32)      # (tq, dH)
        ctx_sc[:, h * dH:(h + 1) * dH] = oh.astype(ctx_sc.dtype)

    # Single out-projection (contraction depth H -> full MXU fill).
    proj = jnp.dot(ctx_sc[...], wo_ref[...],
                   preferred_element_type=jnp.float32)        # (tq, H) f32

    # residual add + LayerNorm (f32 statistics)
    y = xq.astype(jnp.float32) + proj + bo_ref[...]
    mu = jnp.mean(y, axis=-1, keepdims=True)
    yc = y - mu
    var = jnp.mean(yc * yc, axis=-1, keepdims=True)
    out = (yc * jax.lax.rsqrt(var + eps)) * g_ref[...] + bt_ref[...]
    o_ref[0] = out.astype(o_ref.dtype)


def pallas_attn_layer(x, bias, lp, *, n_heads, scale, eps=1e-12):
    B, S, H = x.shape
    dH = H // n_heads
    tq = _pick_row_tile(S)
    n_qt = S // tq

    kernel = functools.partial(_attn_layer_kernel, n_heads=n_heads,
                               scale=scale, eps=eps)
    return pl.pallas_call(
        kernel,
        out_shape=jax.ShapeDtypeStruct((B, S, H), jnp.bfloat16),
        grid=(B, n_qt),
        in_specs=[
            pl.BlockSpec((1, S, H), lambda b, qt: (b, 0, 0)),   # full seq (K/V)
            pl.BlockSpec((1, tq, H), lambda b, qt: (b, qt, 0)),  # q tile
            pl.BlockSpec((1, 1, S), lambda b, qt: (b, 0, 0)),    # mask bias
            _const_spec((n_heads, H, dH)),   # wq (head-major)
            _const_spec((n_heads, H, dH)),   # wk
            _const_spec((n_heads, H, dH)),   # wv
            _const_spec((n_heads, 1, dH)),   # bq
            _const_spec((n_heads, 1, dH)),   # bk
            _const_spec((n_heads, 1, dH)),   # bv
            _const_spec((H, H)),             # wo
            _const_spec((1, H)),             # bo
            _const_spec((1, H)),             # ln gamma
            _const_spec((1, H)),             # ln beta
        ],
        out_specs=pl.BlockSpec((1, tq, H), lambda b, qt: (b, qt, 0)),
        scratch_shapes=[
            pltpu.VMEM((n_heads, S, dH), jnp.bfloat16),  # K cache (per batch)
            pltpu.VMEM((n_heads, S, dH), jnp.bfloat16),  # V cache (per batch)
            pltpu.VMEM((tq, H), jnp.bfloat16),           # per-head ctx concat
        ],
        compiler_params=_mosaic_params(("parallel", "arbitrary")),
    )(x, x, bias, lp["wq"], lp["wk"], lp["wv"], lp["bq"], lp["bk"], lp["bv"],
      lp["wo"], lp["bo"].reshape(1, H), lp["g1"].reshape(1, H),
      lp["be1"].reshape(1, H))


# ----------------------------------------------------------------------------
# Fused FFN + residual + LayerNorm, tiled over tokens (tm <= 256 for v7x VMEM).
# ----------------------------------------------------------------------------
def _ffn_ln_kernel(x_ref, w1_ref, b1_ref, w2_ref, b2_ref, g_ref, bt_ref,
                   o_ref, *, eps):
    x = x_ref[...]                                            # (tm, H) bf16
    h = jnp.dot(x, w1_ref[...], preferred_element_type=jnp.float32)
    h = jax.nn.gelu(h + b1_ref[...], approximate=True)
    f = jnp.dot(h.astype(jnp.bfloat16), w2_ref[...],
                preferred_element_type=jnp.float32) + b2_ref[...]
    y = x.astype(jnp.float32) + f
    mu = jnp.mean(y, axis=-1, keepdims=True)
    yc = y - mu
    var = jnp.mean(yc * yc, axis=-1, keepdims=True)
    out = (yc * jax.lax.rsqrt(var + eps)) * g_ref[...] + bt_ref[...]
    o_ref[...] = out.astype(o_ref.dtype)


def pallas_ffn_ln(x, w1, b1, w2, b2, g, bt, *, eps=1e-12):
    M, H = x.shape
    F = w1.shape[1]
    tm = _pick_row_tile(M)
    return pl.pallas_call(
        functools.partial(_ffn_ln_kernel, eps=eps),
        out_shape=jax.ShapeDtypeStruct((M, H), jnp.bfloat16),
        grid=(M // tm,),
        in_specs=[
            pl.BlockSpec((tm, H), lambda i: (i, 0)),
            _const_spec((H, F)),
            _const_spec((1, F)),
            _const_spec((F, H)),
            _const_spec((1, H)),
            _const_spec((1, H)),
            _const_spec((1, H)),
        ],
        out_specs=pl.BlockSpec((tm, H), lambda i: (i, 0)),
        compiler_params=_mosaic_params(("parallel",)),
    )(x, w1, b1.reshape(1, F), w2, b2.reshape(1, H), g.reshape(1, H),
      bt.reshape(1, H))


# ----------------------------------------------------------------------------
# Classifier head: Linear(H,256) -> ReLU -> Dropout(eval: identity) -> Linear.
# (Per review: microscopic; left untiled.)
# ----------------------------------------------------------------------------
def _classifier_kernel(x_ref, w1_ref, b1_ref, w2_ref, b2_ref, o_ref):
    h = jnp.dot(x_ref[...], w1_ref[...], preferred_element_type=jnp.float32)
    h = jnp.maximum(h + b1_ref[...], 0.0)
    o = jnp.dot(h.astype(jnp.bfloat16), w2_ref[...],
                preferred_element_type=jnp.float32) + b2_ref[...]
    o_ref[...] = o.astype(o_ref.dtype)


def pallas_classifier(pooled, w1, b1, w2, b2):
    B, H = pooled.shape
    Hid = w1.shape[1]
    NL = w2.shape[1]
    return pl.pallas_call(
        _classifier_kernel,
        out_shape=jax.ShapeDtypeStruct((B, NL), jnp.float32),
        grid=(1,),
        in_specs=[
            pl.BlockSpec((B, H), lambda i: (0, 0)),
            pl.BlockSpec((H, Hid), lambda i: (0, 0)),
            pl.BlockSpec((1, Hid), lambda i: (0, 0)),
            pl.BlockSpec((Hid, NL), lambda i: (0, 0)),
            pl.BlockSpec((1, NL), lambda i: (0, 0)),
        ],
        out_specs=pl.BlockSpec((B, NL), lambda i: (0, 0)),
    )(pooled, w1, b1.reshape(1, Hid), w2, b2.reshape(1, NL))


# ----------------------------------------------------------------------------
# Parameters (synthetic XLNet-style backbone; Q/K/V weights stored head-major).
# ----------------------------------------------------------------------------
def init_params(key, *, vocab, H, ff, L, n_heads, num_labels):
    dH = H // n_heads

    def nrm(k, shape, scale=0.02, dtype=jnp.bfloat16):
        return (scale * jax.random.normal(k, shape, dtype=jnp.float32)
                ).astype(dtype)

    def head_major(w):  # (H, H) -> (n_heads, H, dH); one-time host relayout
        return jnp.transpose(w.reshape(H, n_heads, dH), (1, 0, 2))

    keys = jax.random.split(key, 3 + L)
    params = {"emb": nrm(keys[0], (vocab, H)), "layers": []}
    for l in range(L):
        ks = jax.random.split(keys[3 + l], 4)
        wqkv = nrm(ks[0], (H, 3 * H))
        zb = jnp.zeros((n_heads, 1, dH), jnp.float32)
        params["layers"].append(dict(
            wq=head_major(wqkv[:, :H]),
            wk=head_major(wqkv[:, H:2 * H]),
            wv=head_major(wqkv[:, 2 * H:]),
            bq=zb, bk=zb, bv=zb,
            wo=nrm(ks[1], (H, H)), bo=jnp.zeros((H,), jnp.float32),
            g1=jnp.ones((H,), jnp.float32), be1=jnp.zeros((H,), jnp.float32),
            wf1=nrm(ks[2], (H, ff)), bf1=jnp.zeros((ff,), jnp.float32),
            wf2=nrm(ks[3], (ff, H)), bf2=jnp.zeros((H,), jnp.float32),
            g2=jnp.ones((H,), jnp.float32), be2=jnp.zeros((H,), jnp.float32),
        ))
    params["cls_w1"] = nrm(keys[1], (H, 256))
    params["cls_b1"] = jnp.zeros((256,), jnp.float32)
    params["cls_w2"] = nrm(keys[2], (256, num_labels))
    params["cls_b2"] = jnp.zeros((num_labels,), jnp.float32)
    return params


# ----------------------------------------------------------------------------
# Forward pass (glue: embedding lookup, free reshapes, CLS pooling).
# ----------------------------------------------------------------------------
def classification_xlnet_forward(params, input_ids, attention_mask, *, n_heads):
    B, S = input_ids.shape
    H = params["emb"].shape[1]
    dH = H // n_heads
    scale = 1.0 / (dH ** 0.5)
    M = B * S

    # Embedding lookup (glue; bf16 activations).
    x = jnp.take(params["emb"], input_ids, axis=0)             # (B, S, H) bf16

    # Additive attention-mask bias: 0 for attended tokens, -1e9 for padding.
    bias = ((1.0 - attention_mask.astype(jnp.float32)) * -1e9).reshape(B, 1, S)

    for lp in params["layers"]:
        # attention sub-block (QKV + attention + out-proj + residual + LN1)
        x = pallas_attn_layer(x, bias, lp, n_heads=n_heads, scale=scale)
        # FFN + residual + LN2 (token-tiled)
        x2d = pallas_ffn_ln(x.reshape(M, H), lp["wf1"], lp["bf1"],
                            lp["wf2"], lp["bf2"], lp["g2"], lp["be2"])
        x = x2d.reshape(B, S, H)

    # pooled_output = last_hidden_state[:, 0]
    pooled = x[:, 0]                                            # (B, H) bf16

    # classifier: Linear -> ReLU -> Dropout(eval: identity) -> Linear
    logits = pallas_classifier(pooled, params["cls_w1"], params["cls_b1"],
                               params["cls_w2"], params["cls_b2"])
    return logits


# ----------------------------------------------------------------------------
if __name__ == "__main__":
    B, S = 2, 8
    VOCAB, H, N_HEADS, FF, LAYERS = 100, 32, 4, 64, 2
    NUM_LABELS = 2

    key = jax.random.PRNGKey(0)
    k_param, k_ids = jax.random.split(key)

    params = init_params(k_param, vocab=VOCAB, H=H, ff=FF, L=LAYERS,
                         n_heads=N_HEADS, num_labels=NUM_LABELS)

    input_ids = jax.random.randint(k_ids, (B, S), 0, VOCAB, dtype=jnp.int32)
    attention_mask = jnp.ones((B, S), dtype=jnp.int32)
    attention_mask = attention_mask.at[1, 6:].set(0)  # pad tail of sample 1

    logits = classification_xlnet_forward(params, input_ids, attention_mask,
                                          n_heads=N_HEADS)
    logits = jax.block_until_ready(logits)
    assert logits.shape == (B, NUM_LABELS)
    assert bool(jnp.all(jnp.isfinite(logits)))
    print("KERNEL_OK")
</pallas_src>

<mosaic_0001>
module attributes {stable_mosaic.version = 11 : i64} {
  func.func @_k(%arg0: i32, %arg1: memref<8x128xf32, #tpu.memory_space<vmem>>, %arg2: memref<8x128xf32, #tpu.memory_space<vmem>>) attributes {dimension_semantics = [#tpu.dimension_semantics<arbitrary>], iteration_bounds = array<i64: 2>, scalar_prefetch = 0 : i64, scratch_operands = 0 : i64, tpu.core_type = #tpu.core_type<tc>, window_params = [{pipeline_mode = #tpu.pipeline_mode<synchronous>, transform_indices = @transform_0, window_bounds = array<i64: 8, 128>}, {pipeline_mode = #tpu.pipeline_mode<synchronous>, transform_indices = @transform_1, window_bounds = array<i64: 8, 128>}]} {
    %c0 = arith.constant 0 : index
    %c0_0 = arith.constant 0 : index
    %0 = vector.load %arg1[%c0, %c0_0] : memref<8x128xf32, #tpu.memory_space<vmem>>, vector<8x128xf32>
    %cst = arith.constant 1.000000e+00 : f32
    %1 = vector.broadcast %cst : f32 to vector<8x128xf32>
    %2 = arith.addf %0, %1 : vector<8x128xf32>
    %c0_1 = arith.constant 0 : index
    %c0_2 = arith.constant 0 : index
    %3 = vector.load %arg2[%c0_1, %c0_2] : memref<8x128xf32, #tpu.memory_space<vmem>>, vector<8x128xf32>
    tpu.vector_store %arg2[%c0_1, %c0_2], %2 {strides = array<i32>} : memref<8x128xf32, #tpu.memory_space<vmem>>, vector<8x128xf32>,
    return
  }
  func.func @transform_0(%arg0: i32) -> (i32, i32) {
    %c0_i32 = arith.constant 0 : i32
    %c0_i32_0 = arith.constant 0 : i32
    %c0_i32_1 = arith.constant 0 : i32
    return %c0_i32, %c0_i32_0 : i32, i32
  }
  func.func @transform_1(%arg0: i32) -> (i32, i32) {
    %c0_i32 = arith.constant 0 : i32
    %c0_i32_0 = arith.constant 0 : i32
    %c0_i32_1 = arith.constant 0 : i32
    return %c0_i32, %c0_i32_0 : i32, i32
  }
}

module attributes {stable_mosaic.version = 11 : i64} {
  func.func @_attn_layer_kernel(%arg0: i32, %arg1: i32, %arg2: memref<1x8x32xbf16, #tpu.memory_space<vmem>>, %arg3: memref<1x8x32xbf16, #tpu.memory_space<vmem>>, %arg4: memref<1x1x8xf32, #tpu.memory_space<vmem>>, %arg5: memref<4x32x8xbf16, #tpu.memory_space<vmem>>, %arg6: memref<4x32x8xbf16, #tpu.memory_space<vmem>>, %arg7: memref<4x32x8xbf16, #tpu.memory_space<vmem>>, %arg8: memref<4x1x8xf32, #tpu.memory_space<vmem>>, %arg9: memref<4x1x8xf32, #tpu.memory_space<vmem>>, %arg10: memref<4x1x8xf32, #tpu.memory_space<vmem>>, %arg11: memref<32x32xbf16, #tpu.memory_space<vmem>>, %arg12: memref<1x32xf32, #tpu.memory_space<vmem>>, %arg13: memref<1x32xf32, #tpu.memory_space<vmem>>, %arg14: memref<1x32xf32, #tpu.memory_space<vmem>>, %arg15: memref<1x8x32xbf16, #tpu.memory_space<vmem>>, %arg16: memref<4x8x8xbf16, #tpu.memory_space<vmem>>, %arg17: memref<4x8x8xbf16, #tpu.memory_space<vmem>>, %arg18: memref<8x32xbf16, #tpu.memory_space<vmem>>) attributes {dimension_semantics = [#tpu.dimension_semantics<parallel>, #tpu.dimension_semantics<arbitrary>], iteration_bounds = array<i64: 2, 1>, scalar_prefetch = 0 : i64, scratch_operands = 3 : i64, tpu.core_type = #tpu.core_type<tc>, window_params = [{transform_indices = @transform_0, window_bounds = array<i64: 1, 8, 32>}, {transform_indices = @transform_1, window_bounds = array<i64: 1, 8, 32>}, {transform_indices = @transform_2, window_bounds = array<i64: 1, 1, 8>}, {pipeline_mode = #tpu.pipeline_mode<synchronous>, transform_indices = @transform_3, window_bounds = array<i64: 4, 32, 8>}, {pipeline_mode = #tpu.pipeline_mode<synchronous>, transform_indices = @transform_4, window_bounds = array<i64: 4, 32, 8>}, {pipeline_mode = #tpu.pipeline_mode<synchronous>, transform_indices = @transform_5, window_bounds = array<i64: 4, 32, 8>}, {pipeline_mode = #tpu.pipeline_mode<synchronous>, transform_indices = @transform_6, window_bounds = array<i64: 4, 1, 8>}, {pipeline_mode = #tpu.pipeline_mode<synchronous>, transform_indices = @transform_7, window_bounds = array<i64: 4, 1, 8>}, {pipeline_mode = #tpu.pipeline_mode<synchronous>, transform_indices = @transform_8, window_bounds = array<i64: 4, 1, 8>}, {pipeline_mode = #tpu.pipeline_mode<synchronous>, transform_indices = @transform_9, window_bounds = array<i64: 32, 32>}, {pipeline_mode = #tpu.pipeline_mode<synchronous>, transform_indices = @transform_10, window_bounds = array<i64: 1, 32>}, {pipeline_mode = #tpu.pipeline_mode<synchronous>, transform_indices = @transform_11, window_bounds = array<i64: 1, 32>}, {pipeline_mode = #tpu.pipeline_mode<synchronous>, transform_indices = @transform_12, window_bounds = array<i64: 1, 32>}, {transform_indices = @transform_13, window_bounds = array<i64: 1, 8, 32>}]} {
    %c0_i32 = arith.constant 0 : i32
    %0 = arith.cmpi eq, %arg1, %c0_i32 : i32
    %1 = arith.extui %0 : i1 to i32
    %c0_i32_0 = arith.constant 0 : i32
    %2 = arith.cmpi ne, %1, %c0_i32_0 : i32
    scf.if %2 {
      %c0_98 = arith.constant 0 : index
      %c0_99 = arith.constant 0 : index
      %c0_100 = arith.constant 0 : index
      %163 = vector.load %arg2[%c0_98, %c0_99, %c0_100] : memref<1x8x32xbf16, #tpu.memory_space<vmem>>, vector<1x8x32xbf16>
      %164 = vector.shape_cast %163 : vector<1x8x32xbf16> to vector<8x32xbf16>
      %c0_101 = arith.constant 0 : index
      %c0_102 = arith.constant 0 : index
      %c0_103 = arith.constant 0 : index
      %165 = vector.load %arg6[%c0_101, %c0_102, %c0_103] : memref<4x32x8xbf16, #tpu.memory_space<vmem>>, vector<1x32x8xbf16>
      %166 = vector.shape_cast %165 : vector<1x32x8xbf16> to vector<32x8xbf16>
      %cst_104 = arith.constant dense<0.000000e+00> : vector<8x8xf32>
      %167 = tpu.matmul %164, %166, %cst_104 {dimension_numbers = #tpu.dot_dimension_numbers<[1], [0], [0], [1], [0, 0, 1, 1], [], []>} : vector<8x32xbf16>, vector<32x8xbf16>, vector<8x8xf32> -> vector<8x8xf32>
      %c0_105 = arith.constant 0 : index
      %c0_106 = arith.constant 0 : index
      %c0_107 = arith.constant 0 : index
      %168 = vector.load %arg9[%c0_105, %c0_106, %c0_107] : memref<4x1x8xf32, #tpu.memory_space<vmem>>, vector<1x1x8xf32>
      %169 = vector.shape_cast %168 : vector<1x1x8xf32> to vector<1x8xf32>
      %170 = vector.broadcast %169 : vector<1x8xf32> to vector<8x8xf32>
      %171 = arith.addf %167, %170 : vector<8x8xf32>
      %c0_108 = arith.constant 0 : index
      %c0_109 = arith.constant 0 : index
      %c0_110 = arith.constant 0 : index
      %172 = vector.load %arg7[%c0_108, %c0_109, %c0_110] : memref<4x32x8xbf16, #tpu.memory_space<vmem>>, vector<1x32x8xbf16>
      %173 = vector.shape_cast %172 : vector<1x32x8xbf16> to vector<32x8xbf16>
      %cst_111 = arith.constant dense<0.000000e+00> : vector<8x8xf32>
      %174 = tpu.matmul %164, %173, %cst_111 {dimension_numbers = #tpu.dot_dimension_numbers<[1], [0], [0], [1], [0, 0, 1, 1], [], []>} : vector<8x32xbf16>, vector<32x8xbf16>, vector<8x8xf32> -> vector<8x8xf32>
      %c0_112 = arith.constant 0 : index
      %c0_113 = arith.constant 0 : index
      %c0_114 = arith.constant 0 : index
      %175 = vector.load %arg10[%c0_112, %c0_113, %c0_114] : memref<4x1x8xf32, #tpu.memory_space<vmem>>, vector<1x1x8xf32>
      %176 = vector.shape_cast %175 : vector<1x1x8xf32> to vector<1x8xf32>
      %177 = vector.broadcast %176 : vector<1x8xf32> to vector<8x8xf32>
      %178 = arith.addf %174, %177 : vector<8x8xf32>
      %179 = arith.truncf %171 : vector<8x8xf32> to vector<8x8xbf16>
      %c0_115 = arith.constant 0 : index
      %c0_116 = arith.constant 0 : index
      %c0_117 = arith.constant 0 : index
      %180 = vector.load %arg16[%c0_115, %c0_116, %c0_117] : memref<4x8x8xbf16, #tpu.memory_space<vmem>>, vector<1x8x8xbf16>
      %181 = vector.shape_cast %180 : vector<1x8x8xbf16> to vector<8x8xbf16>
      %182 = vector.shape_cast %179 : vector<8x8xbf16> to vector<1x8x8xbf16>
      tpu.vector_store %arg16[%c0_115, %c0_116, %c0_117], %182 {strides = array<i32>} : memref<4x8x8xbf16, #tpu.memory_space<vmem>>, vector<1x8x8xbf16>,
      %183 = arith.truncf %178 : vector<8x8xf32> to vector<8x8xbf16>
      %c0_118 = arith.constant 0 : index
      %c0_119 = arith.constant 0 : index
      %c0_120 = arith.constant 0 : index
      %184 = vector.load %arg17[%c0_118, %c0_119, %c0_120] : memref<4x8x8xbf16, #tpu.memory_space<vmem>>, vector<1x8x8xbf16>
      %185 = vector.shape_cast %184 : vector<1x8x8xbf16> to vector<8x8xbf16>
      %186 = vector.shape_cast %183 : vector<8x8xbf16> to vector<1x8x8xbf16>
      tpu.vector_store %arg17[%c0_118, %c0_119, %c0_120], %186 {strides = array<i32>} : memref<4x8x8xbf16, #tpu.memory_space<vmem>>, vector<1x8x8xbf16>,
      %c1_121 = arith.constant 1 : index
      %c0_122 = arith.constant 0 : index
      %c0_123 = arith.constant 0 : index
      %187 = vector.load %arg6[%c1_121, %c0_122, %c0_123] : memref<4x32x8xbf16, #tpu.memory_space<vmem>>, vector<1x32x8xbf16>
      %188 = vector.shape_cast %187 : vector<1x32x8xbf16> to vector<32x8xbf16>
      %cst_124 = arith.constant dense<0.000000e+00> : vector<8x8xf32>
      %189 = tpu.matmul %164, %188, %cst_124 {dimension_numbers = #tpu.dot_dimension_numbers<[1], [0], [0], [1], [0, 0, 1, 1], [], []>} : vector<8x32xbf16>, vector<32x8xbf16>, vector<8x8xf32> -> vector<8x8xf32>
      %c1_125 = arith.constant 1 : index
      %c0_126 = arith.constant 0 : index
      %c0_127 = arith.constant 0 : index
      %190 = vector.load %arg9[%c1_125, %c0_126, %c0_127] : memref<4x1x8xf32, #tpu.memory_space<vmem>>, vector<1x1x8xf32>
      %191 = vector.shape_cast %190 : vector<1x1x8xf32> to vector<1x8xf32>
      %192 = vector.broadcast %191 : vector<1x8xf32> to vector<8x8xf32>
      %193 = arith.addf %189, %192 : vector<8x8xf32>
      %c1_128 = arith.constant 1 : index
      %c0_129 = arith.constant 0 : index
      %c0_130 = arith.constant 0 : index
      %194 = vector.load %arg7[%c1_128, %c0_129, %c0_130] : memref<4x32x8xbf16, #tpu.memory_space<vmem>>, vector<1x32x8xbf16>
      %195 = vector.shape_cast %194 : vector<1x32x8xbf16> to vector<32x8xbf16>
      %cst_131 = arith.constant dense<0.000000e+00> : vector<8x8xf32>
      %196 = tpu.matmul %164, %195, %cst_131 {dimension_numbers = #tpu.dot_dimension_numbers<[1], [0], [0], [1], [0, 0, 1, 1], [], []>} : vector<8x32xbf16>, vector<32x8xbf16>, vector<8x8xf32> -> vector<8x8xf32>
      %c1_132 = arith.constant 1 : index
      %c0_133 = arith.constant 0 : index
      %c0_134 = arith.constant 0 : index
      %197 = vector.load %arg10[%c1_132, %c0_133, %c0_134] : memref<4x1x8xf32, #tpu.memory_space<vmem>>, vector<1x1x8xf32>
      %198 = vector.shape_cast %197 : vector<1x1x8xf32> to vector<1x8xf32>
      %199 = vector.broadcast %198 : vector<1x8xf32> to vector<8x8xf32>
      %200 = arith.addf %196, %199 : vector<8x8xf32>
      %201 = arith.truncf %193 : vector<8x8xf32> to vector<8x8xbf16>
      %c1_135 = arith.constant 1 : index
      %c0_136 = arith.constant 0 : index
      %c0_137 = arith.constant 0 : index
      %202 = vector.load %arg16[%c1_135, %c0_136, %c0_137] : memref<4x8x8xbf16, #tpu.memory_space<vmem>>, vector<1x8x8xbf16>
      %203 = vector.shape_cast %202 : vector<1x8x8xbf16> to vector<8x8xbf16>
      %204 = vector.shape_cast %201 : vector<8x8xbf16> to vector<1x8x8xbf16>
      tpu.vector_store %arg16[%c1_135, %c0_136, %c0_137], %204 {strides = array<i32>} : memref<4x8x8xbf16, #tpu.memory_space<vmem>>, vector<1x8x8xbf16>,
      %205 = arith.truncf %200 : vector<8x8xf32> to vector<8x8xbf16>
      %c1_138 = arith.constant 1 : index
      %c0_139 = arith.constant 0 : index
      %c0_140 = arith.constant 0 : index
      %206 = vector.load %arg17[%c1_138, %c0_139, %c0_140] : memref<4x8x8xbf16, #tpu.memory_space<vmem>>, vector<1x8x8xbf16>
      %207 = vector.shape_cast %206 : vector<1x8x8xbf16> to vector<8x8xbf16>
      %208 = vector.shape_cast %205 : vector<8x8xbf16> to vector<1x8x8xbf16>
      tpu.vector_store %arg17[%c1_138, %c0_139, %c0_140], %208 {strides = array<i32>} : memref<4x8x8xbf16, #tpu.memory_space<vmem>>, vector<1x8x8xbf16>,
      %c2_141 = arith.constant 2 : index
      %c0_142 = arith.constant 0 : index
      %c0_143 = arith.constant 0 : index
      %209 = vector.load %arg6[%c2_141, %c0_142, %c0_143] : memref<4x32x8xbf16, #tpu.memory_space<vmem>>, vector<1x32x8xbf16>
      %210 = vector.shape_cast %209 : vector<1x32x8xbf16> to vector<32x8xbf16>
      %cst_144 = arith.constant dense<0.000000e+00> : vector<8x8xf32>
      %211 = tpu.matmul %164, %210, %cst_144 {dimension_numbers = #tpu.dot_dimension_numbers<[1], [0], [0], [1], [0, 0, 1, 1], [], []>} : vector<8x32xbf16>, vector<32x8xbf16>, vector<8x8xf32> -> vector<8x8xf32>
      %c2_145 = arith.constant 2 : index
      %c0_146 = arith.constant 0 : index
      %c0_147 = arith.constant 0 : index
      %212 = vector.load %arg9[%c2_145, %c0_146, %c0_147] : memref<4x1x8xf32, #tpu.memory_space<vmem>>, vector<1x1x8xf32>
      %213 = vector.shape_cast %212 : vector<1x1x8xf32> to vector<1x8xf32>
      %214 = vector.broadcast %213 : vector<1x8xf32> to vector<8x8xf32>
      %215 = arith.addf %211, %214 : vector<8x8xf32>
      %c2_148 = arith.constant 2 : index
      %c0_149 = arith.constant 0 : index
      %c0_150 = arith.constant 0 : index
      %216 = vector.load %arg7[%c2_148, %c0_149, %c0_150] : memref<4x32x8xbf16, #tpu.memory_space<vmem>>, vector<1x32x8xbf16>
      %217 = vector.shape_cast %216 : vector<1x32x8xbf16> to vector<32x8xbf16>
      %cst_151 = arith.constant dense<0.000000e+00> : vector<8x8xf32>
      %218 = tpu.matmul %164, %217, %cst_151 {dimension_numbers = #tpu.dot_dimension_numbers<[1], [0], [0], [1], [0, 0, 1, 1], [], []>} : vector<8x32xbf16>, vector<32x8xbf16>, vector<8x8xf32> -> vector<8x8xf32>
      %c2_152 = arith.constant 2 : index
      %c0_153 = arith.constant 0 : index
      %c0_154 = arith.constant 0 : index
      %219 = vector.load %arg10[%c2_152, %c0_153, %c0_154] : memref<4x1x8xf32, #tpu.memory_space<vmem>>, vector<1x1x8xf32>
      %220 = vector.shape_cast %219 : vector<1x1x8xf32> to vector<1x8xf32>
      %221 = vector.broadcast %220 : vector<1x8xf32> to vector<8x8xf32>
      %222 = arith.addf %218, %221 : vector<8x8xf32>
      %223 = arith.truncf %215 : vector<8x8xf32> to vector<8x8xbf16>
      %c2_155 = arith.constant 2 : index
      %c0_156 = arith.constant 0 : index
      %c0_157 = arith.constant 0 : index
      %224 = vector.load %arg16[%c2_155, %c0_156, %c0_157] : memref<4x8x8xbf16, #tpu.memory_space<vmem>>, vector<1x8x8xbf16>
      %225 = vector.shape_cast %224 : vector<1x8x8xbf16> to vector<8x8xbf16>
      %226 = vector.shape_cast %223 : vector<8x8xbf16> to vector<1x8x8xbf16>
      tpu.vector_store %arg16[%c2_155, %c0_156, %c0_157], %226 {strides = array<i32>} : memref<4x8x8xbf16, #tpu.memory_space<vmem>>, vector<1x8x8xbf16>,
      %227 = arith.truncf %222 : vector<8x8xf32> to vector<8x8xbf16>
      %c2_158 = arith.constant 2 : index
      %c0_159 = arith.constant 0 : index
      %c0_160 = arith.constant 0 : index
      %228 = vector.load %arg17[%c2_158, %c0_159, %c0_160] : memref<4x8x8xbf16, #tpu.memory_space<vmem>>, vector<1x8x8xbf16>
      %229 = vector.shape_cast %228 : vector<1x8x8xbf16> to vector<8x8xbf16>
      %230 = vector.shape_cast %227 : vector<8x8xbf16> to vector<1x8x8xbf16>
      tpu.vector_store %arg17[%c2_158, %c0_159, %c0_160], %230 {strides = array<i32>} : memref<4x8x8xbf16, #tpu.memory_space<vmem>>, vector<1x8x8xbf16>,
      %c3_161 = arith.constant 3 : index
      %c0_162 = arith.constant 0 : index
      %c0_163 = arith.constant 0 : index
      %231 = vector.load %arg6[%c3_161, %c0_162, %c0_163] : memref<4x32x8xbf16, #tpu.memory_space<vmem>>, vector<1x32x8xbf16>
      %232 = vector.shape_cast %231 : vector<1x32x8xbf16> to vector<32x8xbf16>
      %cst_164 = arith.constant dense<0.000000e+00> : vector<8x8xf32>
      %233 = tpu.matmul %164, %232, %cst_164 {dimension_numbers = #tpu.dot_dimension_numbers<[1], [0], [0], [1], [0, 0, 1, 1], [], []>} : vector<8x32xbf16>, vector<32x8xbf16>, vector<8x8xf32> -> vector<8x8xf32>
      %c3_165 = arith.constant 3 : index
      %c0_166 = arith.constant 0 : index
      %c0_167 = arith.constant 0 : index
      %234 = vector.load %arg9[%c3_165, %c0_166, %c0_167] : memref<4x1x8xf32, #tpu.memory_space<vmem>>, vector<1x1x8xf32>
      %235 = vector.shape_cast %234 : vector<1x1x8xf32> to vector<1x8xf32>
      %236 = vector.broadcast %235 : vector<1x8xf32> to vector<8x8xf32>
      %237 = arith.addf %233, %236 : vector<8x8xf32>
      %c3_168 = arith.constant 3 : index
      %c0_169 = arith.constant 0 : index
      %c0_170 = arith.constant 0 : index
      %238 = vector.load %arg7[%c3_168, %c0_169, %c0_170] : memref<4x32x8xbf16, #tpu.memory_space<vmem>>, vector<1x32x8xbf16>
      %239 = vector.shape_cast %238 : vector<1x32x8xbf16> to vector<32x8xbf16>
      %cst_171 = arith.constant dense<0.000000e+00> : vector<8x8xf32>
      %240 = tpu.matmul %164, %239, %cst_171 {dimension_numbers = #tpu.dot_dimension_numbers<[1], [0], [0], [1], [0, 0, 1, 1], [], []>} : vector<8x32xbf16>, vector<32x8xbf16>, vector<8x8xf32> -> vector<8x8xf32>
      %c3_172 = arith.constant 3 : index
      %c0_173 = arith.constant 0 : index
      %c0_174 = arith.constant 0 : index
      %241 = vector.load %arg10[%c3_172, %c0_173, %c0_174] : memref<4x1x8xf32, #tpu.memory_space<vmem>>, vector<1x1x8xf32>
      %242 = vector.shape_cast %241 : vector<1x1x8xf32> to vector<1x8xf32>
      %243 = vector.broadcast %242 : vector<1x8xf32> to vector<8x8xf32>
      %244 = arith.addf %240, %243 : vector<8x8xf32>
      %245 = arith.truncf %237 : vector<8x8xf32> to vector<8x8xbf16>
      %c3_175 = arith.constant 3 : index
      %c0_176 = arith.constant 0 : index
      %c0_177 = arith.constant 0 : index
      %246 = vector.load %arg16[%c3_175, %c0_176, %c0_177] : memref<4x8x8xbf16, #tpu.memory_space<vmem>>, vector<1x8x8xbf16>
      %247 = vector.shape_cast %246 : vector<1x8x8xbf16> to vector<8x8xbf16>
      %248 = vector.shape_cast %245 : vector<8x8xbf16> to vector<1x8x8xbf16>
      tpu.vector_store %arg16[%c3_175, %c0_176, %c0_177], %248 {strides = array<i32>} : memref<4x8x8xbf16, #tpu.memory_space<vmem>>, vector<1x8x8xbf16>,
      %249 = arith.truncf %244 : vector<8x8xf32> to vector<8x8xbf16>
      %c3_178 = arith.constant 3 : index
      %c0_179 = arith.constant 0 : index
      %c0_180 = arith.constant 0 : index
      %250 = vector.load %arg17[%c3_178, %c0_179, %c0_180] : memref<4x8x8xbf16, #tpu.memory_space<vmem>>, vector<1x8x8xbf16>
      %251 = vector.shape_cast %250 : vector<1x8x8xbf16> to vector<8x8xbf16>
      %252 = vector.shape_cast %249 : vector<8x8xbf16> to vector<1x8x8xbf16>
      tpu.vector_store %arg17[%c3_178, %c0_179, %c0_180], %252 {strides = array<i32>} : memref<4x8x8xbf16, #tpu.memory_space<vmem>>, vector<1x8x8xbf16>,
    } else {
    }
    %c0 = arith.constant 0 : index
    %c0_1 = arith.constant 0 : index
    %c0_2 = arith.constant 0 : index
    %3 = vector.load %arg3[%c0, %c0_1, %c0_2] : memref<1x8x32xbf16, #tpu.memory_space<vmem>>, vector<1x8x32xbf16>
    %4 = vector.shape_cast %3 : vector<1x8x32xbf16> to vector<8x32xbf16>
    %c0_3 = arith.constant 0 : index
    %c0_4 = arith.constant 0 : index
    %c0_5 = arith.constant 0 : index
    %5 = vector.load %arg4[%c0_3, %c0_4, %c0_5] : memref<1x1x8xf32, #tpu.memory_space<vmem>>, vector<1x1x8xf32>
    %6 = vector.shape_cast %5 : vector<1x1x8xf32> to vector<1x8xf32>
    %7 = vector.shape_cast %6 : vector<1x8xf32> to vector<1x8xf32>
    %8 = vector.broadcast %7 : vector<1x8xf32> to vector<8x8xf32>
    %c0_6 = arith.constant 0 : index
    %c0_7 = arith.constant 0 : index
    %c0_8 = arith.constant 0 : index
    %9 = vector.load %arg5[%c0_6, %c0_7, %c0_8] : memref<4x32x8xbf16, #tpu.memory_space<vmem>>, vector<1x32x8xbf16>
    %10 = vector.shape_cast %9 : vector<1x32x8xbf16> to vector<32x8xbf16>
    %cst = arith.constant dense<0.000000e+00> : vector<8x8xf32>
    %11 = tpu.matmul %4, %10, %cst {dimension_numbers = #tpu.dot_dimension_numbers<[1], [0], [0], [1], [0, 0, 1, 1], [], []>} : vector<8x32xbf16>, vector<32x8xbf16>, vector<8x8xf32> -> vector<8x8xf32>
    %c0_9 = arith.constant 0 : index
    %c0_10 = arith.constant 0 : index
    %c0_11 = arith.constant 0 : index
    %12 = vector.load %arg8[%c0_9, %c0_10, %c0_11] : memref<4x1x8xf32, #tpu.memory_space<vmem>>, vector<1x1x8xf32>
    %13 = vector.shape_cast %12 : vector<1x1x8xf32> to vector<1x8xf32>
    %14 = vector.broadcast %13 : vector<1x8xf32> to vector<8x8xf32>
    %15 = arith.addf %11, %14 : vector<8x8xf32>
    %16 = arith.truncf %15 : vector<8x8xf32> to vector<8x8xbf16>
    %c0_12 = arith.constant 0 : index
    %c0_13 = arith.constant 0 : index
    %c0_14 = arith.constant 0 : index
    %17 = vector.load %arg16[%c0_12, %c0_13, %c0_14] : memref<4x8x8xbf16, #tpu.memory_space<vmem>>, vector<1x8x8xbf16>
    %18 = vector.shape_cast %17 : vector<1x8x8xbf16> to vector<8x8xbf16>
    %cst_15 = arith.constant dense<0.000000e+00> : vector<8x8xf32>
    %19 = tpu.matmul %16, %18, %cst_15 {dimension_numbers = #tpu.dot_dimension_numbers<[1], [1], [0], [0], [0, 0, 1, 0], [], []>} : vector<8x8xbf16>, vector<8x8xbf16>, vector<8x8xf32> -> vector<8x8xf32>
    %cst_16 = arith.constant 0.353553385 : f32
    %20 = vector.broadcast %cst_16 : f32 to vector<8x8xf32>
    %21 = arith.mulf %19, %20 : vector<8x8xf32>
    %22 = arith.addf %21, %8 : vector<8x8xf32>
    %cst_17 = arith.constant dense<0xFF800000> : vector<8xf32>
    %23 = vector.multi_reduction <maximumf>, %22, %cst_17 [1] : vector<8x8xf32> to vector<8xf32>
    %24 = vector.shape_cast %23 : vector<8xf32> to vector<8x1xf32>
    %25 = vector.broadcast %24 : vector<8x1xf32> to vector<8x8xf32>
    %26 = arith.subf %22, %25 : vector<8x8xf32>
    %27 = math.exp %26 : vector<8x8xf32>
    %cst_18 = arith.constant dense<0.000000e+00> : vector<8xf32>
    %28 = vector.multi_reduction <add>, %27, %cst_18 [1] : vector<8x8xf32> to vector<8xf32>
    %29 = vector.shape_cast %28 : vector<8xf32> to vector<8x1xf32>
    %30 = tpu.reciprocal %29 {approx = true} : vector<8x1xf32> -> vector<8x1xf32>
    %31 = vector.broadcast %30 : vector<8x1xf32> to vector<8x8xf32>
    %32 = arith.mulf %27, %31 : vector<8x8xf32>
    %33 = arith.truncf %32 : vector<8x8xf32> to vector<8x8xbf16>
    %c0_19 = arith.constant 0 : index
    %c0_20 = arith.constant 0 : index
    %c0_21 = arith.constant 0 : index
    %34 = vector.load %arg17[%c0_19, %c0_20, %c0_21] : memref<4x8x8xbf16, #tpu.memory_space<vmem>>, vector<1x8x8xbf16>
    %35 = vector.shape_cast %34 : vector<1x8x8xbf16> to vector<8x8xbf16>
    %cst_22 = arith.constant dense<0.000000e+00> : vector<8x8xf32>
    %36 = tpu.matmul %33, %35, %cst_22 {dimension_numbers = #tpu.dot_dimension_numbers<[1], [0], [0], [1], [0, 0, 1, 1], [], []>} : vector<8x8xbf16>, vector<8x8xbf16>, vector<8x8xf32> -> vector<8x8xf32>
    %37 = arith.truncf %36 : vector<8x8xf32> to vector<8x8xbf16>
    %c0_23 = arith.constant 0 : index
    %c0_24 = arith.constant 0 : index
    %38 = vector.load %arg18[%c0_23, %c0_24] : memref<8x32xbf16, #tpu.memory_space<vmem>>, vector<8x8xbf16>
    tpu.vector_store %arg18[%c0_23, %c0_24], %37 {strides = array<i32>} : memref<8x32xbf16, #tpu.memory_space<vmem>>, vector<8x8xbf16>,
    %c1 = arith.constant 1 : index
    %c0_25 = arith.constant 0 : index
    %c0_26 = arith.constant 0 : index
    %39 = vector.load %arg5[%c1, %c0_25, %c0_26] : memref<4x32x8xbf16, #tpu.memory_space<vmem>>, vector<1x32x8xbf16>
    %40 = vector.shape_cast %39 : vector<1x32x8xbf16> to vector<32x8xbf16>
    %cst_27 = arith.constant dense<0.000000e+00> : vector<8x8xf32>
    %41 = tpu.matmul %4, %40, %cst_27 {dimension_numbers = #tpu.dot_dimension_numbers<[1], [0], [0], [1], [0, 0, 1, 1], [], []>} : vector<8x32xbf16>, vector<32x8xbf16>, vector<8x8xf32> -> vector<8x8xf32>
    %c1_28 = arith.constant 1 : index
    %c0_29 = arith.constant 0 : index
    %c0_30 = arith.constant 0 : index
    %42 = vector.load %arg8[%c1_28, %c0_29, %c0_30] : memref<4x1x8xf32, #tpu.memory_space<vmem>>, vector<1x1x8xf32>
    %43 = vector.shape_cast %42 : vector<1x1x8xf32> to vector<1x8xf32>
    %44 = vector.broadcast %43 : vector<1x8xf32> to vector<8x8xf32>
    %45 = arith.addf %41, %44 : vector<8x8xf32>
    %46 = arith.truncf %45 : vector<8x8xf32> to vector<8x8xbf16>
    %c1_31 = arith.constant 1 : index
    %c0_32 = arith.constant 0 : index
    %c0_33 = arith.constant 0 : index
    %47 = vector.load %arg16[%c1_31, %c0_32, %c0_33] : memref<4x8x8xbf16, #tpu.memory_space<vmem>>, vector<1x8x8xbf16>
    %48 = vector.shape_cast %47 : vector<1x8x8xbf16> to vector<8x8xbf16>
    %cst_34 = arith.constant dense<0.000000e+00> : vector<8x8xf32>
    %49 = tpu.matmul %46, %48, %cst_34 {dimension_numbers = #tpu.dot_dimension_numbers<[1], [1], [0], [0], [0, 0, 1, 0], [], []>} : vector<8x8xbf16>, vector<8x8xbf16>, vector<8x8xf32> -> vector<8x8xf32>
    %cst_35 = arith.constant 0.353553385 : f32
    %50 = vector.broadcast %cst_35 : f32 to vector<8x8xf32>
    %51 = arith.mulf %49, %50 : vector<8x8xf32>
    %52 = arith.addf %51, %8 : vector<8x8xf32>
    %cst_36 = arith.constant dense<0xFF800000> : vector<8xf32>
    %53 = vector.multi_reduction <maximumf>, %52, %cst_36 [1] : vector<8x8xf32> to vector<8xf32>
    %54 = vector.shape_cast %53 : vector<8xf32> to vector<8x1xf32>
    %55 = vector.broadcast %54 : vector<8x1xf32> to vector<8x8xf32>
    %56 = arith.subf %52, %55 : vector<8x8xf32>
    %57 = math.exp %56 : vector<8x8xf32>
    %cst_37 = arith.constant dense<0.000000e+00> : vector<8xf32>
    %58 = vector.multi_reduction <add>, %57, %cst_37 [1] : vector<8x8xf32> to vector<8xf32>
    %59 = vector.shape_cast %58 : vector<8xf32> to vector<8x1xf32>
    %60 = tpu.reciprocal %59 {approx = true} : vector<8x1xf32> -> vector<8x1xf32>
    %61 = vector.broadcast %60 : vector<8x1xf32> to vector<8x8xf32>
    %62 = arith.mulf %57, %61 : vector<8x8xf32>
    %63 = arith.truncf %62 : vector<8x8xf32> to vector<8x8xbf16>
    %c1_38 = arith.constant 1 : index
    %c0_39 = arith.constant 0 : index
    %c0_40 = arith.constant 0 : index
    %64 = vector.load %arg17[%c1_38, %c0_39, %c0_40] : memref<4x8x8xbf16, #tpu.memory_space<vmem>>, vector<1x8x8xbf16>
    %65 = vector.shape_cast %64 : vector<1x8x8xbf16> to vector<8x8xbf16>
    %cst_41 = arith.constant dense<0.000000e+00> : vector<8x8xf32>
    %66 = tpu.matmul %63, %65, %cst_41 {dimension_numbers = #tpu.dot_dimension_numbers<[1], [0], [0], [1], [0, 0, 1, 1], [], []>} : vector<8x8xbf16>, vector<8x8xbf16>, vector<8x8xf32> -> vector<8x8xf32>
    %67 = arith.truncf %66 : vector<8x8xf32> to vector<8x8xbf16>
    %c0_42 = arith.constant 0 : index
    %c8 = arith.constant 8 : index
    %68 = vector.load %arg18[%c0_42, %c8] : memref<8x32xbf16, #tpu.memory_space<vmem>>, vector<8x8xbf16>
    tpu.vector_store %arg18[%c0_42, %c8], %67 {strides = array<i32>} : memref<8x32xbf16, #tpu.memory_space<vmem>>, vector<8x8xbf16>,
    %c2 = arith.constant 2 : index
    %c0_43 = arith.constant 0 : index
    %c0_44 = arith.constant 0 : index
    %69 = vector.load %arg5[%c2, %c0_43, %c0_44] : memref<4x32x8xbf16, #tpu.memory_space<vmem>>, vector<1x32x8xbf16>
    %70 = vector.shape_cast %69 : vector<1x32x8xbf16> to vector<32x8xbf16>
    %cst_45 = arith.constant dense<0.000000e+00> : vector<8x8xf32>
    %71 = tpu.matmul %4, %70, %cst_45 {dimension_numbers = #tpu.dot_dimension_numbers<[1], [0], [0], [1], [0, 0, 1, 1], [], []>} : vector<8x32xbf16>, vector<32x8xbf16>, vector<8x8xf32> -> vector<8x8xf32>
    %c2_46 = arith.constant 2 : index
    %c0_47 = arith.constant 0 : index
    %c0_48 = arith.constant 0 : index
    %72 = vector.load %arg8[%c2_46, %c0_47, %c0_48] : memref<4x1x8xf32, #tpu.memory_space<vmem>>, vector<1x1x8xf32>
    %73 = vector.shape_cast %72 : vector<1x1x8xf32> to vector<1x8xf32>
    %74 = vector.broadcast %73 : vector<1x8xf32> to vector<8x8xf32>
    %75 = arith.addf %71, %74 : vector<8x8xf32>
    %76 = arith.truncf %75 : vector<8x8xf32> to vector<8x8xbf16>
    %c2_49 = arith.constant 2 : index
    %c0_50 = arith.constant 0 : index
    %c0_51 = arith.constant 0 : index
    %77 = vector.load %arg16[%c2_49, %c0_50, %c0_51] : memref<4x8x8xbf16, #tpu.memory_space<vmem>>, vector<1x8x8xbf16>
    %78 = vector.shape_cast %77 : vector<1x8x8xbf16> to vector<8x8xbf16>
    %cst_52 = arith.constant dense<0.000000e+00> : vector<8x8xf32>
    %79 = tpu.matmul %76, %78, %cst_52 {dimension_numbers = #tpu.dot_dimension_numbers<[1], [1], [0], [0], [0, 0, 1, 0], [], []>} : vector<8x8xbf16>, vector<8x8xbf16>, vector<8x8xf32> -> vector<8x8xf32>
    %cst_53 = arith.constant 0.353553385 : f32
    %80 = vector.broadcast %cst_53 : f32 to vector<8x8xf32>
    %81 = arith.mulf %79, %80 : vector<8x8xf32>
    %82 = arith.addf %81, %8 : vector<8x8xf32>
    %cst_54 = arith.constant dense<0xFF800000> : vector<8xf32>
    %83 = vector.multi_reduction <maximumf>, %82, %cst_54 [1] : vector<8x8xf32> to vector<8xf32>
    %84 = vector.shape_cast %83 : vector<8xf32> to vector<8x1xf32>
    %85 = vector.broadcast %84 : vector<8x1xf32> to vector<8x8xf32>
    %86 = arith.subf %82, %85 : vector<8x8xf32>
    %87 = math.exp %86 : vector<8x8xf32>
    %cst_55 = arith.constant dense<0.000000e+00> : vector<8xf32>
    %88 = vector.multi_reduction <add>, %87, %cst_55 [1] : vector<8x8xf32> to vector<8xf32>
    %89 = vector.shape_cast %88 : vector<8xf32> to vector<8x1xf32>
    %90 = tpu.reciprocal %89 {approx = true} : vector<8x1xf32> -> vector<8x1xf32>
    %91 = vector.broadcast %90 : vector<8x1xf32> to vector<8x8xf32>
    %92 = arith.mulf %87, %91 : vector<8x8xf32>
    %93 = arith.truncf %92 : vector<8x8xf32> to vector<8x8xbf16>
    %c2_56 = arith.constant 2 : index
    %c0_57 = arith.constant 0 : index
    %c0_58 = arith.constant 0 : index
    %94 = vector.load %arg17[%c2_56, %c0_57, %c0_58] : memref<4x8x8xbf16, #tpu.memory_space<vmem>>, vector<1x8x8xbf16>
    %95 = vector.shape_cast %94 : vector<1x8x8xbf16> to vector<8x8xbf16>
    %cst_59 = arith.constant dense<0.000000e+00> : vector<8x8xf32>
    %96 = tpu.matmul %93, %95, %cst_59 {dimension_numbers = #tpu.dot_dimension_numbers<[1], [0], [0], [1], [0, 0, 1, 1], [], []>} : vector<8x8xbf16>, vector<8x8xbf16>, vector<8x8xf32> -> vector<8x8xf32>
    %97 = arith.truncf %96 : vector<8x8xf32> to vector<8x8xbf16>
    %c0_60 = arith.constant 0 : index
    %c16 = arith.constant 16 : index
    %98 = vector.load %arg18[%c0_60, %c16] : memref<8x32xbf16, #tpu.memory_space<vmem>>, vector<8x8xbf16>
    tpu.vector_store %arg18[%c0_60, %c16], %97 {strides = array<i32>} : memref<8x32xbf16, #tpu.memory_space<vmem>>, vector<8x8xbf16>,
    %c3 = arith.constant 3 : index
    %c0_61 = arith.constant 0 : index
    %c0_62 = arith.constant 0 : index
    %99 = vector.load %arg5[%c3, %c0_61, %c0_62] : memref<4x32x8xbf16, #tpu.memory_space<vmem>>, vector<1x32x8xbf16>
    %100 = vector.shape_cast %99 : vector<1x32x8xbf16> to vector<32x8xbf16>
    %cst_63 = arith.constant dense<0.000000e+00> : vector<8x8xf32>
    %101 = tpu.matmul %4, %100, %cst_63 {dimension_numbers = #tpu.dot_dimension_numbers<[1], [0], [0], [1], [0, 0, 1, 1], [], []>} : vector<8x32xbf16>, vector<32x8xbf16>, vector<8x8xf32> -> vector<8x8xf32>
    %c3_64 = arith.constant 3 : index
    %c0_65 = arith.constant 0 : index
    %c0_66 = arith.constant 0 : index
    %102 = vector.load %arg8[%c3_64, %c0_65, %c0_66] : memref<4x1x8xf32, #tpu.memory_space<vmem>>, vector<1x1x8xf32>
    %103 = vector.shape_cast %102 : vector<1x1x8xf32> to vector<1x8xf32>
    %104 = vector.broadcast %103 : vector<1x8xf32> to vector<8x8xf32>
    %105 = arith.addf %101, %104 : vector<8x8xf32>
    %106 = arith.truncf %105 : vector<8x8xf32> to vector<8x8xbf16>
    %c3_67 = arith.constant 3 : index
    %c0_68 = arith.constant 0 : index
    %c0_69 = arith.constant 0 : index
    %107 = vector.load %arg16[%c3_67, %c0_68, %c0_69] : memref<4x8x8xbf16, #tpu.memory_space<vmem>>, vector<1x8x8xbf16>
    %108 = vector.shape_cast %107 : vector<1x8x8xbf16> to vector<8x8xbf16>
    %cst_70 = arith.constant dense<0.000000e+00> : vector<8x8xf32>
    %109 = tpu.matmul %106, %108, %cst_70 {dimension_numbers = #tpu.dot_dimension_numbers<[1], [1], [0], [0], [0, 0, 1, 0], [], []>} : vector<8x8xbf16>, vector<8x8xbf16>, vector<8x8xf32> -> vector<8x8xf32>
    %cst_71 = arith.constant 0.353553385 : f32
    %110 = vector.broadcast %cst_71 : f32 to vector<8x8xf32>
    %111 = arith.mulf %109, %110 : vector<8x8xf32>
    %112 = arith.addf %111, %8 : vector<8x8xf32>
    %cst_72 = arith.constant dense<0xFF800000> : vector<8xf32>
    %113 = vector.multi_reduction <maximumf>, %112, %cst_72 [1] : vector<8x8xf32> to vector<8xf32>
    %114 = vector.shape_cast %113 : vector<8xf32> to vector<8x1xf32>
    %115 = vector.broadcast %114 : vector<8x1xf32> to vector<8x8xf32>
    %116 = arith.subf %112, %115 : vector<8x8xf32>
    %117 = math.exp %116 : vector<8x8xf32>
    %cst_73 = arith.constant dense<0.000000e+00> : vector<8xf32>
    %118 = vector.multi_reduction <add>, %117, %cst_73 [1] : vector<8x8xf32> to vector<8xf32>
    %119 = vector.shape_cast %118 : vector<8xf32> to vector<8x1xf32>
    %120 = tpu.reciprocal %119 {approx = true} : vector<8x1xf32> -> vector<8x1xf32>
    %121 = vector.broadcast %120 : vector<8x1xf32> to vector<8x8xf32>
    %122 = arith.mulf %117, %121 : vector<8x8xf32>
    %123 = arith.truncf %122 : vector<8x8xf32> to vector<8x8xbf16>
    %c3_74 = arith.constant 3 : index
    %c0_75 = arith.constant 0 : index
    %c0_76 = arith.constant 0 : index
    %124 = vector.load %arg17[%c3_74, %c0_75, %c0_76] : memref<4x8x8xbf16, #tpu.memory_space<vmem>>, vector<1x8x8xbf16>
    %125 = vector.shape_cast %124 : vector<1x8x8xbf16> to vector<8x8xbf16>
    %cst_77 = arith.constant dense<0.000000e+00> : vector<8x8xf32>
    %126 = tpu.matmul %123, %125, %cst_77 {dimension_numbers = #tpu.dot_dimension_numbers<[1], [0], [0], [1], [0, 0, 1, 1], [], []>} : vector<8x8xbf16>, vector<8x8xbf16>, vector<8x8xf32> -> vector<8x8xf32>
    %127 = arith.truncf %126 : vector<8x8xf32> to vector<8x8xbf16>
    %c0_78 = arith.constant 0 : index
    %c24 = arith.constant 24 : index
    %128 = vector.load %arg18[%c0_78, %c24] : memref<8x32xbf16, #tpu.memory_space<vmem>>, vector<8x8xbf16>
    tpu.vector_store %arg18[%c0_78, %c24], %127 {strides = array<i32>} : memref<8x32xbf16, #tpu.memory_space<vmem>>, vector<8x8xbf16>,
    %c0_79 = arith.constant 0 : index
    %c0_80 = arith.constant 0 : index
    %129 = vector.load %arg18[%c0_79, %c0_80] : memref<8x32xbf16, #tpu.memory_space<vmem>>, vector<8x32xbf16>
    %c0_81 = arith.constant 0 : index
    %c0_82 = arith.constant 0 : index
    %130 = vector.load %arg11[%c0_81, %c0_82] : memref<32x32xbf16, #tpu.memory_space<vmem>>, vector<32x32xbf16>
    %cst_83 = arith.constant dense<0.000000e+00> : vector<8x32xf32>
    %131 = tpu.matmul %129, %130, %cst_83 {dimension_numbers = #tpu.dot_dimension_numbers<[1], [0], [0], [1], [0, 0, 1, 1], [], []>} : vector<8x32xbf16>, vector<32x32xbf16>, vector<8x32xf32> -> vector<8x32xf32>
    %132 = arith.extf %4 : vector<8x32xbf16> to vector<8x32xf32>
    %133 = arith.addf %132, %131 : vector<8x32xf32>
    %c0_84 = arith.constant 0 : index
    %c0_85 = arith.constant 0 : index
    %134 = vector.load %arg12[%c0_84, %c0_85] : memref<1x32xf32, #tpu.memory_space<vmem>>, vector<1x32xf32>
    %135 = vector.broadcast %134 : vector<1x32xf32> to vector<8x32xf32>
    %136 = arith.addf %133, %135 : vector<8x32xf32>
    %cst_86 = arith.constant dense<0.000000e+00> : vector<8xf32>
    %137 = vector.multi_reduction <add>, %136, %cst_86 [1] : vector<8x32xf32> to vector<8xf32>
    %138 = vector.shape_cast %137 : vector<8xf32> to vector<8x1xf32>
    %cst_87 = arith.constant 3.200000e+01 : f32
    %139 = vector.broadcast %cst_87 : f32 to vector<8x1xf32>
    %140 = arith.divf %138, %139 : vector<8x1xf32>
    %141 = vector.broadcast %140 : vector<8x1xf32> to vector<8x32xf32>
    %142 = arith.subf %136, %141 : vector<8x32xf32>
    %143 = arith.mulf %142, %142 : vector<8x32xf32>
    %cst_88 = arith.constant dense<0.000000e+00> : vector<8xf32>
    %144 = vector.multi_reduction <add>, %143, %cst_88 [1] : vector<8x32xf32> to vector<8xf32>
    %145 = vector.shape_cast %144 : vector<8xf32> to vector<8x1xf32>
    %cst_89 = arith.constant 3.200000e+01 : f32
    %146 = vector.broadcast %cst_89 : f32 to vector<8x1xf32>
    %147 = arith.divf %145, %146 : vector<8x1xf32>
    %cst_90 = arith.constant 9.99999996E-13 : f32
    %148 = vector.broadcast %cst_90 : f32 to vector<8x1xf32>
    %149 = arith.addf %147, %148 : vector<8x1xf32>
    %150 = math.rsqrt %149 : vector<8x1xf32>
    %151 = vector.broadcast %150 : vector<8x1xf32> to vector<8x32xf32>
    %152 = arith.mulf %142, %151 : vector<8x32xf32>
    %c0_91 = arith.constant 0 : index
    %c0_92 = arith.constant 0 : index
    %153 = vector.load %arg13[%c0_91, %c0_92] : memref<1x32xf32, #tpu.memory_space<vmem>>, vector<1x32xf32>
    %154 = vector.broadcast %153 : vector<1x32xf32> to vector<8x32xf32>
    %155 = arith.mulf %152, %154 : vector<8x32xf32>
    %c0_93 = arith.constant 0 : index
    %c0_94 = arith.constant 0 : index
    %156 = vector.load %arg14[%c0_93, %c0_94] : memref<1x32xf32, #tpu.memory_space<vmem>>, vector<1x32xf32>
    %157 = vector.broadcast %156 : vector<1x32xf32> to vector<8x32xf32>
    %158 = arith.addf %155, %157 : vector<8x32xf32>
    %159 = arith.truncf %158 : vector<8x32xf32> to vector<8x32xbf16>
    %c0_95 = arith.constant 0 : index
    %c0_96 = arith.constant 0 : index
    %c0_97 = arith.constant 0 : index
    %160 = vector.load %arg15[%c0_95, %c0_96, %c0_97] : memref<1x8x32xbf16, #tpu.memory_space<vmem>>, vector<1x8x32xbf16>
    %161 = vector.shape_cast %160 : vector<1x8x32xbf16> to vector<8x32xbf16>
    %162 = vector.shape_cast %159 : vector<8x32xbf16> to vector<1x8x32xbf16>
    tpu.vector_store %arg15[%c0_95, %c0_96, %c0_97], %162 {strides = array<i32>} : memref<1x8x32xbf16, #tpu.memory_space<vmem>>, vector<1x8x32xbf16>,
    return
  }
  func.func @transform_0(%arg0: i32, %arg1: i32) -> (i32, i32, i32) {
    %c0_i32 = arith.constant 0 : i32
    %c0_i32_0 = arith.constant 0 : i32
    %c0_i32_1 = arith.constant 0 : i32
    return %arg0, %c0_i32, %c0_i32_0 : i32, i32, i32
  }
  func.func @transform_1(%arg0: i32, %arg1: i32) -> (i32, i32, i32) {
    %c0_i32 = arith.constant 0 : i32
    %c0_i32_0 = arith.constant 0 : i32
    return %arg0, %arg1, %c0_i32 : i32, i32, i32
  }
  func.func @transform_2(%arg0: i32, %arg1: i32) -> (i32, i32, i32) {
    %c0_i32 = arith.constant 0 : i32
    %c0_i32_0 = arith.constant 0 : i32
    %c0_i32_1 = arith.constant 0 : i32
    return %arg0, %c0_i32, %c0_i32_0 : i32, i32, i32
  }
  func.func @transform_3(%arg0: i32, %arg1: i32) -> (i32, i32, i32) {
    %c0_i32 = arith.constant 0 : i32
    %c0_i32_0 = arith.constant 0 : i32
    %c0_i32_1 = arith.constant 0 : i32
    %c0_i32_2 = arith.constant 0 : i32
    return %c0_i32, %c0_i32_0, %c0_i32_1 : i32, i32, i32
  }
  func.func @transform_4(%arg0: i32, %arg1: i32) -> (i32, i32, i32) {
    %c0_i32 = arith.constant 0 : i32
    %c0_i32_0 = arith.constant 0 : i32
    %c0_i32_1 = arith.constant 0 : i32
    %c0_i32_2 = arith.constant 0 : i32
    return %c0_i32, %c0_i32_0, %c0_i32_1 : i32, i32, i32
  }
  func.func @transform_5(%arg0: i32, %arg1: i32) -> (i32, i32, i32) {
    %c0_i32 = arith.constant 0 : i32
    %c0_i32_0 = arith.constant 0 : i32
    %c0_i32_1 = arith.constant 0 : i32
    %c0_i32_2 = arith.constant 0 : i32
    return %c0_i32, %c0_i32_0, %c0_i32_1 : i32, i32, i32
  }
  func.func @transform_6(%arg0: i32, %arg1: i32) -> (i32, i32, i32) {
    %c0_i32 = arith.constant 0 : i32
    %c0_i32_0 = arith.constant 0 : i32
    %c0_i32_1 = arith.constant 0 : i32
    %c0_i32_2 = arith.constant 0 : i32
    return %c0_i32, %c0_i32_0, %c0_i32_1 : i32, i32, i32
  }
  func.func @transform_7(%arg0: i32, %arg1: i32) -> (i32, i32, i32) {
    %c0_i32 = arith.constant 0 : i32
    %c0_i32_0 = arith.constant 0 : i32
    %c0_i32_1 = arith.constant 0 : i32
    %c0_i32_2 = arith.constant 0 : i32
    return %c0_i32, %c0_i32_0, %c0_i32_1 : i32, i32, i32
  }
  func.func @transform_8(%arg0: i32, %arg1: i32) -> (i32, i32, i32) {
    %c0_i32 = arith.constant 0 : i32
    %c0_i32_0 = arith.constant 0 : i32
    %c0_i32_1 = arith.constant 0 : i32
    %c0_i32_2 = arith.constant 0 : i32
    return %c0_i32, %c0_i32_0, %c0_i32_1 : i32, i32, i32
  }
  func.func @transform_9(%arg0: i32, %arg1: i32) -> (i32, i32) {
    %c0_i32 = arith.constant 0 : i32
    %c0_i32_0 = arith.constant 0 : i32
    %c0_i32_1 = arith.constant 0 : i32
    return %c0_i32, %c0_i32_0 : i32, i32
  }
  func.func @transform_10(%arg0: i32, %arg1: i32) -> (i32, i32) {
    %c0_i32 = arith.constant 0 : i32
    %c0_i32_0 = arith.constant 0 : i32
    %c0_i32_1 = arith.constant 0 : i32
    return %c0_i32, %c0_i32_0 : i32, i32
  }
  func.func @transform_11(%arg0: i32, %arg1: i32) -> (i32, i32) {
    %c0_i32 = arith.constant 0 : i32
    %c0_i32_0 = arith.constant 0 : i32
    %c0_i32_1 = arith.constant 0 : i32
    return %c0_i32, %c0_i32_0 : i32, i32
  }
  func.func @transform_12(%arg0: i32, %arg1: i32) -> (i32, i32) {
    %c0_i32 = arith.constant 0 : i32
    %c0_i32_0 = arith.constant 0 : i32
    %c0_i32_1 = arith.constant 0 : i32
    return %c0_i32, %c0_i32_0 : i32, i32
  }
  func.func @transform_13(%arg0: i32, %arg1: i32) -> (i32, i32, i32) {
    %c0_i32 = arith.constant 0 : i32
    %c0_i32_0 = arith.constant 0 : i32
    return %arg0, %arg1, %c0_i32 : i32, i32, i32
  }
}

</mosaic_0001>

<bundles_post_ra>
// kernel: tpu_custom_call.1
= control target key start
LH: loop header
LB: loop body
LE: loop exit
PB: predicated region body
PF: predicated region fallthrough
CT: control target
= control target key end

     0   :  { %6 = vsyncpa [#allocation3], 0  ;;  %s341_s0 = inlined_call_operand.hbm [shape: f32[8,128], index: 0, kind: input, shape index: {}]   ;;  %s342_s1 = inlined_call_operand.hbm [shape: f32[8,128], index: 1, kind: output, shape index: {}]  }
   0x1   :  { %7 = vsyncpa [#allocation4], 0  ;;  %s262_s6 = smov 0  }
   0x2 LB: > { %s145_s7 = sadd.s32 4294967295, %s248_s6   ;;  %p146_p0 = scmp.ge.s32.totalorder %s248_s6, 1  ;;  %s248_s6 = sphi %s262_s6, %s13_s6  }
   0x3   : > { %p60_p1 = scmp.lt.s32.totalorder %s248_s6, 3  ;;  %p276_p3 = scmp.eq.s32.totalorder %s145_s7, 0 }
   0x4   : > { %s250_s10 = smov [#allocation2]   ;;  %s180_s15 = scalar_lea.hbm %s341_s0, 128 }
   0x5   : > { %p270_p2 = pnand %p146_p0, %p60_p1  ;;  %s73_s11 = sshll.u32 %s250_s10, 4  ;;  %s74_s11 = int_to_ptr.vmem [resolvable:$true] %s73_s11 }
   0x6   : > { %s347_s9 = scalar_select %p276_p3, 1, 0 }
   0x7   : > { %s346_s8 = scalar_select %p270_p2, 1, 0 }
   0x8   : > { %p162_p4 = pneg %p270_p2  ;;  %p181_p6 = scmp.ne.s32.totalorder %s341_s0, %s180_s15 }
   0x9   : > { %p187_p10 = scmp.lt.u32.totalorder %s180_s15, %s341_s0 }
   0xa   : > { %p284_p5 = pnand %p276_p3, %p162_p4 }
   0xc   : > { %p182_p7 = pneg %p284_p5 }
   0xe   : > { %p183_p8 = pnand %p182_p7, %p181_p6 }
  0x10   : > { %p184_p9 = pneg %p183_p8 }
  0x12   : > { %p189_p11 = pnand %p187_p10, %p184_p9 }
  0x14   : > { %192 = shalt.err (!%p189_p11)
}
  0x15   : > { %s193_s20 = scalar_lea.vmem %s74_s11, 128  ;;  %p201_p1 = scmp.lt.s32.totalorder %s74_s11, %s74_s11 }
  0x16   : > { %p194_p12 = scmp.ne.s32.totalorder %s74_s11, %s193_s20  ;;  %p202_p4 = scmp.lt.s32.totalorder %s193_s20, %s193_s20 }
  0x18   : > { %p196_p13 = pnand %p194_p12, %p182_p7  ;;  %p203_p3 = por %p202_p4, %p201_p1 }
  0x1a   : > { %p197_p0 = pneg %p196_p13 }
  0x1c   : > { %p204_p2 = pnand %p203_p3, %p197_p0 }
  0x1e   : > { %207 = shalt.err (!%p204_p2)
}
  0x1f   : > { %165 = dma.hbm_to_vmem [thread:$0]  (!%p284_p5), %s341_s0, 128, %s74_s11, [#allocation3]  }
  0x20   : > { %p349_p6 = scmp.ne.s32.totalorder %s346_s8, 0 }
  0x21   : > { %p350_p8 = scmp.ne.s32.totalorder (!%p349_p6), %s347_s9, 0 }
  0x22   : > { %86 = sbr.rel (%p349_p6) target bundleno = 67 (0x43), region = 24 }
  0x29   : > { %239 = dma.done.wait (%p350_p8), [#allocation3], 128  }
  0x2a   : > { %241 = vsyncadd (%p350_p8), [#allocation3], 4294967168  ;;  %s251_s23 = smov [#allocation5]   ;;  %v96_v0 = vld [vmem:[#allocation2] sm:$0xff]  ;;  %p312_p2 = scmp.eq.s32.totalorder %s145_s7, 1 }
  0x2b   : > { %s106_s24 = sshll.u32 %s251_s23, 4  ;;  %v97_v1 = vadd.f32 1.0, %v96_v0  ;;  %s107_s24 = int_to_ptr.vmem [resolvable:$true] %s106_s24 }
  0x2c   : > { %s208_s26 = scalar_lea.vmem %s107_s24, 128  ;;  %p215_p9 = scmp.lt.s32.totalorder %s107_s24, %s107_s24 }
  0x2d   : > { %98 = vst [vmem:[#allocation5] sm:$0xff] %v97_v1  ;;  %p209_p3 = scmp.ne.s32.totalorder %s107_s24, %s208_s26  ;;  %p216_p10 = scmp.lt.s32.totalorder %s208_s26, %s208_s26 }
  0x2f   : > { %p210_p5 = pnand %p209_p3, %p312_p2  ;;  %p217_p11 = por %p216_p10, %p215_p9 }
  0x31   : > { %p211_p7 = pneg %p210_p5 }
  0x33   : > { %p218_p12 = pnand %p217_p11, %p211_p7 }
  0x35   : > { %221 = shalt.err (!%p218_p12)
}
  0x36   : > { %s222_s29 = scalar_lea.hbm %s342_s1, 128 }
  0x37   : > { %p223_p13 = scmp.ne.s32.totalorder %s342_s1, %s222_s29  ;;  %p228_p4 = scmp.lt.u32.totalorder %s222_s29, %s342_s1 }
  0x39   : > { %p224_p0 = pnand %p223_p13, %p312_p2 }
  0x3b   : > { %p225_p1 = pneg %p224_p0 }
  0x3d   : > { %p230_p6 = pnand %p228_p4, %p225_p1 }
  0x3f   : > { %233 = shalt.err (!%p230_p6)
}
  0x40   : > { %159 = dma.vmem_to_hbm [thread:$0]  (%p312_p2), %s107_s24, 128, %s342_s1, [#allocation4]  }
  0x41   : > { %243 = dma.done.wait (%p312_p2), [#allocation4], 128  }
  0x42   : > { %245 = vsyncadd (%p312_p2), [#allocation4], 4294967168 }
  0x43 PF: > { %s13_s6 = sadd.s32 1, %s248_s6  }
  0x44   : > { %p10_p8 = scmp.ge.s32.totalorder %s13_s6, 4  }
  0x46   :  { %12 = sbr.rel (!%p10_p8) target bundleno = 2 (0x2), region = 53 }
  0x4d   :  { %119 = vsyncpa [#allocation3], 1 }
  0x4e   :  { %121 = vsyncpa [#allocation3 + $0x1], 1 }
  0x4f   :  { %122 = vsyncpa [#allocation4], 1 }
  0x50   :  { %124 = vsyncpa [#allocation4 + $0x1], 1 }

// kernel: tpu_custom_call.1
= control target key start
LH: loop header
LB: loop body
LE: loop exit
PB: predicated region body
PF: predicated region fallthrough
CT: control target
= control target key end

     0   :  { %s2984_s0 = inlined_call_operand.vmem [shape: bf16[2,8,32], index: 0, kind: input, shape index: {}]   ;;  %s2985_s1 = inlined_call_operand.vmem [shape: bf16[2,8,32], index: 1, kind: input, shape index: {}]   ;;  %s2986_s2 = inlined_call_operand.vmem [shape: f32[2,1,8], index: 2, kind: input, shape index: {}]   ;;  %s2987_s3 = inlined_call_operand.vmem [shape: bf16[4,32,8], index: 3, kind: input, shape index: {}]   ;;  %s2988_s4 = inlined_call_operand.vmem [shape: bf16[4,32,8], index: 4, kind: input, shape index: {}]   ;;  %s2989_s5 = inlined_call_operand.vmem [shape: bf16[4,32,8], index: 5, kind: input, shape index: {}]   ;;  %s2990_s6 = inlined_call_operand.vmem [shape: f32[4,1,8], index: 6, kind: input, shape index: {}]   ;;  %s2991_s7 = inlined_call_operand.vmem [shape: f32[4,1,8], index: 7, kind: input, shape index: {}]   ;;  %s2992_s8 = inlined_call_operand.vmem [shape: f32[4,1,8], index: 8, kind: input, shape index: {}]   ;;  %s2993_s9 = inlined_call_operand.vmem [shape: bf16[32,32], index: 9, kind: input, shape index: {}]   ;;  %s2994_s10 = inlined_call_operand.vmem [shape: f32[1,32], index: 10, kind: input, shape index: {}]   ;;  %s2995_s11 = inlined_call_operand.vmem [shape: f32[1,32], index: 11, kind: input, shape index: {}]   ;;  %s2996_s12 = inlined_call_operand.vmem [shape: f32[1,32], index: 12, kind: input, shape index: {}]   ;;  %s2997_s13 = inlined_call_operand.hbm [shape: bf16[2,8,32], index: 13, kind: output, shape index: {}]  }
   0x1   :  { %3001 = sst [smem:[#allocation10_spill]] %s2984_s0 }
   0x2   :  { %3002 = sst [smem:[#allocation11_spill]] %s2985_s1 }
   0x3   :  { %3003 = sst [smem:[#allocation12_spill]] %s2986_s2 }
   0x4   :  { %18 = vsyncpa [#allocation6], 0 }
   0x5   :  { %20 = vsyncpa [#allocation6 + $0x1], 0  ;;  %s2588_s25 = smov 0   ;;  %s2590_s26 = smov 0  }
   0x6   :  { %s2592_s27 = smov 0   ;;  %s2594_s28 = smov 0  }
   0x7   :  { %s2596_s29 = smov 0   ;;  %s2598_s30 = smov 0  }
   0x8 LB: > { %3004 = sst [smem:[#allocation8_spill]] %s2506_s29  ;;  %s1995_s14 = sadd.s32 4294967295, %s2510_s30   ;;  %s2510_s30 = sphi %s2598_s30, %s26_s30   ;;  %s2506_s29 = sphi %s2596_s29, %s3013_s29   ;;  %s2502_s28 = sphi %s2594_s28, %s3012_s28   ;;  %s2498_s27 = sphi %s2592_s27, %s3016_s27   ;;  %s2494_s26 = sphi %s2590_s26, %s3015_s26   ;;  %s2490_s25 = sphi %s2588_s25, %s3014_s25  }
   0x9   : > { %s1996_s15 = sadd.s32 4294967294, %s2510_s30   ;;  %s38_s16 = sadd.s32 1, %s2506_s29 }
   0xa   : > { %s337_s17 = sadd.s32 1, %s2498_s27  ;;  %p40_p0 = scmp.ge.s32.totalorder %s38_s16, 2 }
   0xb   : > { %p347_p1 = scmp.ne.s32.totalorder %s2498_s27, %s2494_s26  ;;  %p348_p2 = scmp.eq.s32.totalorder %s1995_s14, 1 }
   0xc   : > { %p353_p3 = scmp.ne.s32.totalorder %s2494_s26, %s2490_s25  ;;  %s3018_s16 = smov (%p40_p0, %s38_s16), 0 }
   0xd   : > { %3005 = sst [smem:[#allocation9_spill]] %s3018_s16  ;;  %p2628_p4 = por %p348_p2, %p347_p1 }
   0xe   : > { %p354_p5 = scmp.eq.s32.totalorder %s1996_s15, 1  ;;  %s332_s19 = ssub.s32 %s2506_s29, %s3018_s16 }
   0xf   : > { %p1999_p6 = scmp.ge.s32.totalorder %s2510_s30, 1  ;;  %p335_p7 = scmp.eq.s32.totalorder %s332_s19, 0 }
  0x10   : > { %p2635_p8 = por %p354_p5, %p353_p3  ;;  %p425_p9 = scmp.lt.s32.totalorder %s2510_s30, 3 }
  0x11   : > { %s2641_s21 = scalar_select %p335_p7, %s2498_s27, %s337_s17  }
  0x12   : > { %p426_p10 = pnand %p1999_p6, %p425_p9 }
  0x13   : > { %v2388_v0 = vld [vmem:[%s2988_s4] sm:$0xff] (!%p426_p10)   ;;  %v2512_v1 = vmov (!%p426_p10), 0.0   ;;  %v2389_v2 = vld [vmem:[%s2988_s4 + $0x8] sm:$0xff] (!%p426_p10)   ;;  %vm2513_vm0 = vmmov (!%p426_p10), 0   ;;  %p478_p11 = scmp.lt.s32.totalorder (!%p426_p10), %s2502_s28, 1  ;;  %vm521_vm1 = vcmask (!%p426_p10), 261120  }
  0x14   : > { %429 = sbr.rel (%p426_p10) target bundleno = 3314 (0xcf2), region = 72  ;;  %2176 = vmatprep.subr.bf16.mxu0 (!%p426_p10), %v2512_v1  ;;  %2184 = vmatprep.subr.bf16.mxu1 (!%p426_p10), %v2512_v1  ;;  %v2390_v3 = vld [vmem:[%s2988_s4 + $0x10] sm:$0xff] (!%p426_p10)   ;;  %s3008_s0 = sld [smem:[#allocation10_spill]] (!%p426_p10)  ;;  %v2391_v5 = vld [vmem:[%s2988_s4 + $0x18] sm:$0xff] (!%p426_p10)   ;;  %v2398_v6 = vld [vmem:[%s2989_s5] sm:$0xff] (!%p426_p10)   ;;  %vm629_vm2 = vcmask (!%p426_p10), 60416  }
  0x15   : > { %2177 = vmatpush3.bf16.msra.mxu0 (!%p426_p10), %v2388_v0  ;;  %2180 = vmatprep.mubr.msk.bf16.mxu0 (!%p426_p10), %vm2513_vm0, %v2512_v1  ;;  %v2399_v7 = vld [vmem:[%s2989_s5 + $0x8] sm:$0xff] (!%p426_p10)   ;;  %v2392_v8 = vld [vmem:[%s2988_s4 + $0x20] sm:$0xff] (!%p426_p10)   ;;  %v2400_v10 = vld [vmem:[%s2989_s5 + $0x10] sm:$0xff] (!%p426_p10)   ;;  %s3010_s1 = sld [smem:[#allocation11_spill]] (!%p426_p10)  ;;  %vm1118_vm3 = vcmask (!%p426_p10), 64512   ;;  %vm1183_vm4 = vcmask (!%p426_p10), 1043456  }
  0x16   : > { %2178 = vmatprep.subr.bf16.mxu0 (!%p426_p10), %v2512_v1  ;;  %2188 = vmatprep.mubr.msk.bf16.mxu1 (!%p426_p10), %vm2513_vm0, %v2512_v1  ;;  %v2393_v9 = vld [vmem:[%s2988_s4 + $0x28] sm:$0xff] (!%p426_p10)   ;;  %v2401_v11 = vld [vmem:[%s2989_s5 + $0x18] sm:$0xff] (!%p426_p10)   ;;  %v2394_v12 = vld [vmem:[%s2988_s4 + $0x30] sm:$0xff] (!%p426_p10)   ;;  %s3011_s2 = sld [smem:[#allocation12_spill]] (!%p426_p10)  ;;  %vm1413_vm5 = vcmask (!%p426_p10), 126016   ;;  %s2515_s29 = smov (!%p426_p10), 16  }
  0x17   : > { %2185 = vmatpush3.bf16.msra.mxu1 (!%p426_p10), %v2398_v6  ;;  %v2402_v13 = vld [vmem:[%s2989_s5 + $0x20] sm:$0xff] (!%p426_p10)   ;;  %v2395_v14 = vld [vmem:[%s2988_s4 + $0x38] sm:$0xff] (!%p426_p10)   ;;  %v2403_v15 = vld [vmem:[%s2989_s5 + $0x28] sm:$0xff] (!%p426_p10)   ;;  %vm1598_vm6 = vcmask (!%p426_p10), 191616   ;;  %vm1783_vm7 = vcmask (!%p426_p10), 257216   ;;  %vm1886_vm8 = vcmask (!%p426_p10), 257024  }
  0x18   : > { %2186 = vmatprep.subr.bf16.mxu1 (!%p426_p10), %v2512_v1  ;;  %v2396_v16 = vld [vmem:[%s2987_s3] sm:$0xff] (!%p426_p10)   ;;  %v2397_v17 = vld [vmem:[%s2987_s3 + $0x8] sm:$0xff] (!%p426_p10)   ;;  %v2404_v19 = vld [vmem:[%s2989_s5 + $0x30] sm:$0xff] (!%p426_p10)  }
  0x19   : > { %2179 = vmatpush3.bf16.msra.mxu0 (!%p426_p10), %v2389_v2  ;;  %v2405_v20 = vld [vmem:[%s2989_s5 + $0x38] sm:$0xff] (!%p426_p10)   ;;  %v2003_v21 = vld [vmem:[%s2991_s7] ss:$0 sm:$0xff] (!%p426_p10)  ;;  %v2016_v28 = vld [vmem:[%s2991_s7 + $0x1] ss:$0 sm:$0xff] (!%p426_p10) }
  0x1a   : > { %2192 = vmatprep.subr.bf16.mxu0 (!%p426_p10), %v2512_v1  ;;  %v2007_v32 = vld [vmem:[%s2992_s8] ss:$0 sm:$0xff] (!%p426_p10)  ;;  %v2034_v42 = vld [vmem:[%s2991_s7 + $0x2] ss:$0 sm:$0xff] (!%p426_p10)  ;;  %v2025_v48 = vld [vmem:[%s2992_s8 + $0x1] ss:$0 sm:$0xff] (!%p426_p10) }
  0x1b   : > { %s2658_s15 = scalar_select %p478_p11, %s2502_s28, 1  ;;  %2187 = vmatpush3.bf16.msra.mxu1 %v2399_v7  ;;  %v2052_v56 = vld [vmem:[%s2991_s7 + $0x3] ss:$0 sm:$0xff]  ;;  %v2043_v0 = vld [vmem:[%s2992_s8 + $0x2] ss:$0 sm:$0xff] }
  0x1c   : > { %2200 = vmatprep.subr.bf16.mxu1 %v2512_v1 }
  0x1d   : > { %s3000_s17 = sshll.u32 %s2658_s15, 2  ;;  %s3009_s19 = sshll.u32 %s2658_s15, 2 }
  0x1e   : > { %s481_s14 = scalar_lea.vmem %s3008_s0, %s3000_s17  ;;  %s488_s23 = scalar_lea.vmem %s3010_s1, %s3009_s19 }
  0x1f   : > { %v2670_v4 = vld [vmem:[%s481_s14] sm:$0xf]  ;;  %s491_s19 = scalar_lea.vmem %s3011_s2, %s2658_s15  ;;  %s2514_s14 = smov 8  }
  0x20   : > { %2181 = vmatmul.mubr.msk.bf16.vlgmr.msra.gmra.mrb[0].mxu0 %vm521_vm1, %v2670_v4  ;;  %2189 = vmatmul.mubr.msk.bf16.vlgmr.msra.gmra.mrb[0].mxu1 %vm521_vm1, %v2670_v4  ;;  %v2757_v18 = vld [vmem:[%s488_s23] sm:$0xf]  ;;  %s2516_s17 = smov 24  }
  0x21   : > { %2193 = vmatpush3.bf16.msra.mxu0 %v2390_v3  ;;  %2196 = vmatprep.mubr.msk.bf16.mxu0 %vm2513_vm0, %v2512_v1 }
  0x22   : > { %2194 = vmatprep.subr.bf16.mxu0 %v2512_v1  ;;  %2201 = vmatpush3.bf16.msra.mxu1 %v2400_v10 }
  0x23   : > { %2204 = vmatprep.mubr.msk.bf16.mxu1 %vm2513_vm0, %v2512_v1  ;;  %2202 = vmatprep.subr.bf16.mxu1 %v2512_v1 }
  0x25   : > { %2195 = vmatpush3.bf16.msra.mxu0 %v2391_v5 }
  0x26   : > { %2208 = vmatprep.subr.bf16.mxu0 %v2512_v1  ;;  %2203 = vmatpush3.bf16.msra.mxu1 %v2401_v11 }
  0x27   : > { %2216 = vmatprep.subr.bf16.mxu1 %v2512_v1 }
  0x28   : > { %2197 = vmatmul.mubr.msk.bf16.vlgmr.msra.gmra.mrb[4].mxu0 %vm521_vm1, %v2670_v4 }
  0x29   : > { %2209 = vmatpush3.bf16.msra.mxu0 %v2392_v8  ;;  %2212 = vmatprep.mubr.msk.bf16.mxu0 %vm2513_vm0, %v2512_v1 }
  0x2a   : > { %2210 = vmatprep.subr.bf16.mxu0 %v2512_v1  ;;  %2205 = vmatmul.mubr.msk.bf16.vlgmr.msra.gmra.mrb[4].mxu1 %vm521_vm1, %v2670_v4 }
  0x2b   : > { %2217 = vmatpush3.bf16.msra.mxu1 %v2402_v13  ;;  %2220 = vmatprep.mubr.msk.bf16.mxu1 %vm2513_vm0, %v2512_v1 }
  0x2c   : > { %2218 = vmatprep.subr.bf16.mxu1 %v2512_v1 }
  0x2d   : > { %2211 = vmatpush3.bf16.msra.mxu0 %v2393_v9  ;;  %v2066_v9 = vld [vmem:[%s2990_s6] ss:$0 sm:$0xff] }
  0x2e   : > { %2224 = vmatprep.subr.bf16.mxu0 %v2512_v1 }
  0x2f   : > { %2219 = vmatpush3.bf16.msra.mxu1 %v2403_v15 }
  0x30   : > { %2213 = vmatmul.mubr.msk.bf16.vlgmr.msra.gmra.mrb[8].mxu0 %vm521_vm1, %v2670_v4  ;;  %2232 = vmatprep.subr.bf16.mxu1 %v2512_v1 }
  0x31   : > { %2225 = vmatpush3.bf16.msra.mxu0 %v2394_v12  ;;  %2228 = vmatprep.mubr.msk.bf16.mxu0 %vm2513_vm0, %v2512_v1 }
  0x32   : > { %2226 = vmatprep.subr.bf16.mxu0 %v2512_v1  ;;  %2221 = vmatmul.mubr.msk.bf16.vlgmr.msra.gmra.mrb[8].mxu1 %vm521_vm1, %v2670_v4 }
  0x33   : > { %2236 = vmatprep.mubr.msk.bf16.mxu1 %vm2513_vm0, %v2512_v1  ;;  %2233 = vmatpush3.bf16.msra.mxu1 %v2404_v19 }
  0x34   : > { %2234 = vmatprep.subr.bf16.mxu1 %v2512_v1 }
  0x35   : > { %2227 = vmatpush3.bf16.msra.mxu0 %v2395_v14 }
  0x36   : > { %2240 = vmatprep.subr.bf16.mxu0 %v2512_v1 }
  0x37   : > { %2235 = vmatpush3.bf16.msra.mxu1 %v2405_v20  ;;  %v2407_v20 = vld [vmem:[%s2987_s3 + $0x18] sm:$0xff]  }
  0x38   : > { %2229 = vmatmul.mubr.msk.bf16.vlgmr.msra.gmra.mrb[12].mxu0 %vm521_vm1, %v2670_v4  ;;  %2248 = vmatprep.subr.bf16.mxu1 %v2512_v1 }
  0x39   : > { %2241 = vmatpush3.bf16.msra.mxu0 %v2396_v16  ;;  %2244 = vmatprep.mubr.msk.bf16.mxu0 %vm2513_vm0, %v2512_v1  ;;  %v2406_v16 = vld [vmem:[%s2987_s3 + $0x10] sm:$0xff]  }
  0x3a   : > { %2242 = vmatprep.subr.bf16.mxu0 %v2512_v1  ;;  %2237 = vmatmul.mubr.msk.bf16.vlgmr.msra.gmra.mrb[12].mxu1 %vm521_vm1, %v2670_v4 }
  0x3b   : > { %2250 = vmatprep.mubr.msk.bf16.mxu1 %vm2513_vm0, %v2512_v1 }
  0x3d   : > { %2243 = vmatpush3.bf16.msra.mxu0 %v2397_v17 }
  0x3e   : > { %2254 = vmatprep.subr.bf16.mxu0 %v2512_v1 }
  0x40   : > { %2245 = vmatmul.mubr.msk.bf16.vlgmr.msra.gmra.mrb[16].mxu0 %vm521_vm1, %v2757_v18 }
  0x41   : > { %2256 = vmatprep.mubr.msk.bf16.mxu0 %vm2513_vm0, %v2512_v1 }
  0xf3   : > { %v559_v22 = vpop.f32.mrb[0].mxu0  ;;  %v622_v36 = vpop.f32.mrb[0].mxu1 }
  0xf4   : > { %v560_v23 = vadd.f32 %v2003_v21, %v559_v22  ;;  %v2182_v24 = vpop.f32.mrb[1].mxu0  ;;  %v623_v38 = vadd.f32 %v2007_v32, %v622_v36  ;;  %v2190_v39 = vpop.f32.mrb[1].mxu1 }
  0xf5   : > { %v562_v25 = vpop.f32.mrb[2].mxu0  ;;  %v625_v41 = vpop.f32.mrb[2].mxu1 }
  0xf6   : > { %v628_v26 = vpack.c.bf16 %v560_v23, %v560_v23  ;;  %v2183_v27 = vpop.f32.mrb[3].mxu0  ;;  %v631_v43 = vpack.c.bf16 %v623_v38, %v623_v38  ;;  %v2191_v44 = vpop.f32.mrb[3].mxu1  ;;  %v2061_v23 = vld [vmem:[%s2992_s8 + $0x3] ss:$0 sm:$0xff] }
  0xf8   : > { %630 = vst.msk [vmem:[#allocation2] sm:$0xf] %vm629_vm2, %v628_v26  ;;  %632 = vst.msk [vmem:[#allocation3] sm:$0xf] %vm629_vm2, %v631_v43 }
  0xfb   : > { %v692_v29 = vpop.f32.mrb[4].mxu0 }
  0xfc   : > { %v693_v30 = vadd.f32 %v2016_v28, %v692_v29  ;;  %v2198_v31 = vpop.f32.mrb[5].mxu0 }
  0xfd   : > { %v695_v33 = vpop.f32.mrb[6].mxu0  ;;  %v757_v52 = vpop.f32.mrb[4].mxu1  ;;  %v2836_v31 = vld [vmem:[%s491_s19] ss:$0 sm:$0xff] }
  0xfe   : > { %v763_v34 = vpack.c.bf16 %v693_v30, %v693_v30  ;;  %v2199_v35 = vpop.f32.mrb[7].mxu0  ;;  %v758_v53 = vadd.f32 %v2025_v48, %v757_v52  ;;  %v2206_v54 = vpop.f32.mrb[5].mxu1 }
  0xff   : > { %v1117_v37 = vld [vmem:[#allocation2] sm:$0xf]  ;;  %v760_v55 = vpop.f32.mrb[6].mxu1  ;;  %v1179_v59 = vld [vmem:[#allocation3] sm:$0xf] }
 0x100   : > { %765 = vst.msk [vmem:[#allocation2 + $0x4] sm:$0xf] %vm629_vm2, %v763_v34  ;;  %v1123_v40 = vsel %vm1118_vm3, %v1117_v37, 0  ;;  %v766_v57 = vpack.c.bf16 %v758_v53, %v758_v53  ;;  %v2207_v58 = vpop.f32.mrb[7].mxu1  ;;  %v1185_v61 = vsel %vm1183_vm4, %v1179_v59, 0 }
 0x101   : > { %2249 = vmatpush3.bf16.xpose.msra.mxu1 %v1123_v40  ;;  %2255 = vmatpush3.bf16.msra.mxu0 %v1185_v61 }
 0x102   : > { %2260 = vmatprep.subr.bf16.mxu1 %v2512_v1  ;;  %768 = vst.msk [vmem:[#allocation3 + $0x4] sm:$0xf] %vm629_vm2, %v766_v57  ;;  %2268 = vmatprep.subr.bf16.mxu0 %v2512_v1  ;;  %v2409_v57 = vld [vmem:[%s2987_s3 + $0x28] sm:$0xff]  }
 0x103   : > { %v828_v45 = vpop.f32.mrb[8].mxu0 }
 0x104   : > { %v829_v46 = vadd.f32 %v2034_v42, %v828_v45  ;;  %v2214_v47 = vpop.f32.mrb[9].mxu0 }
 0x105   : > { %v831_v49 = vpop.f32.mrb[10].mxu0  ;;  %v893_v5 = vpop.f32.mrb[8].mxu1 }
 0x106   : > { %v899_v50 = vpack.c.bf16 %v829_v46, %v829_v46  ;;  %v2215_v51 = vpop.f32.mrb[11].mxu0  ;;  %v894_v6 = vadd.f32 %v2043_v0, %v893_v5  ;;  %v2222_v7 = vpop.f32.mrb[9].mxu1 }
 0x107   : > { %v896_v8 = vpop.f32.mrb[10].mxu1  ;;  %v2077_v51 = vld [vmem:[%s2990_s6 + $0x1] ss:$0 sm:$0xff] }
 0x108   : > { %901 = vst.msk [vmem:[#allocation2 + $0x8] sm:$0xf] %vm629_vm2, %v899_v50  ;;  %v902_v10 = vpack.c.bf16 %v894_v6, %v894_v6  ;;  %v2223_v11 = vpop.f32.mrb[11].mxu1  ;;  %v1297_v50 = vld [vmem:[#allocation2 + $0x4] sm:$0xf] }
 0x109   : > { %v1359_v21 = vld [vmem:[#allocation3 + $0x4] sm:$0xf]  ;;  %v1302_v53 = vsel %vm1118_vm3, %v1297_v50, 0 }
 0x10a   : > { %904 = vst.msk [vmem:[#allocation3 + $0x8] sm:$0xf] %vm629_vm2, %v902_v10  ;;  %v1364_v22 = vsel %vm1183_vm4, %v1359_v21, 0 }
 0x10b   : > { %v964_v60 = vpop.f32.mrb[12].mxu0 }
 0x10c   : > { %v965_v62 = vadd.f32 %v2052_v56, %v964_v60  ;;  %v2230_v63 = vpop.f32.mrb[13].mxu0  ;;  %v2408_v56 = vld [vmem:[%s2987_s3 + $0x20] sm:$0xff]  }
 0x10d   : > { %v967_v2 = vpop.f32.mrb[14].mxu0  ;;  %v1029_v24 = vpop.f32.mrb[12].mxu1 }
 0x10e   : > { %v1035_v3 = vpack.c.bf16 %v965_v62, %v965_v62  ;;  %v2231_v4 = vpop.f32.mrb[15].mxu0  ;;  %v1030_v25 = vadd.f32 %v2061_v23, %v1029_v24  ;;  %v2238_v26 = vpop.f32.mrb[13].mxu1  ;;  %v2089_v23 = vld [vmem:[%s2990_s6 + $0x2] ss:$0 sm:$0xff] }
 0x10f   : > { %v1032_v27 = vpop.f32.mrb[14].mxu1 }
 0x110   : > { %1037 = vst.msk [vmem:[#allocation2 + $0xc] sm:$0xf] %vm629_vm2, %v1035_v3  ;;  %v1038_v28 = vpack.c.bf16 %v1030_v25, %v1030_v25  ;;  %v2239_v29 = vpop.f32.mrb[15].mxu1 }
 0x111   : > { %v1544_v58 = vld [vmem:[#allocation3 + $0x8] sm:$0xf] }
 0x112   : > { %1040 = vst.msk [vmem:[#allocation3 + $0xc] sm:$0xf] %vm629_vm2, %v1038_v28  ;;  %v1549_v59 = vsel %vm1183_vm4, %v1544_v58, 0  ;;  %v2410_v28 = vld [vmem:[%s2987_s3 + $0x30] sm:$0xff]   ;;  %v2411_v29 = vld [vmem:[%s2987_s3 + $0x38] sm:$0xff]  }
 0x113   : > { %v1110_v12 = vpop.f32.mrb[16].mxu0 }
 0x114   : > { %v1111_v13 = vadd.f32 %v2066_v9, %v1110_v12  ;;  %v2246_v14 = vpop.f32.mrb[17].mxu0 }
 0x115   : > { %v1113_v15 = vpop.f32.mrb[18].mxu0 }
 0x116   : > { %v1116_v17 = vpack.c.bf16 %v1111_v13, %v1111_v13  ;;  %v2247_v19 = vpop.f32.mrb[19].mxu0 }
 0x118   : > { %2251 = vmatmul.mubr.msk.bf16.vlgmr.msra.gmra.mrb[16].mxu1 %vm1118_vm3, %v1116_v17 }
 0x119   : > { %2261 = vmatpush3.bf16.msra.mxu1 %v2406_v16  ;;  %2264 = vmatprep.mubr.msk.bf16.mxu1 %vm2513_vm0, %v2512_v1 }
 0x11a   : > { %2262 = vmatprep.subr.bf16.mxu1 %v2512_v1 }
 0x11d   : > { %2263 = vmatpush3.bf16.msra.mxu1 %v2407_v20 }
 0x11e   : > { %2274 = vmatprep.subr.bf16.mxu1 %v2512_v1 }
 0x120   : > { %2265 = vmatmul.mubr.msk.bf16.vlgmr.msra.gmra.mrb[20].mxu1 %vm521_vm1, %v2757_v18 }
 0x121   : > { %2275 = vmatpush3.bf16.msra.mxu1 %v1364_v22  ;;  %2276 = vmatprep.mubr.msk.bf16.mxu1 %vm2513_vm0, %v2512_v1  ;;  %v1482_v22 = vld [vmem:[#allocation2 + $0x8] sm:$0xf] }
 0x122   : > { %2288 = vmatprep.subr.bf16.mxu1 %v2512_v1  ;;  %v1487_v25 = vsel %vm1118_vm3, %v1482_v22, 0 }
 0x1eb   : > { %v1159_v30 = vpop.f32.mrb[16].mxu1 }
 0x1ec   : > { %v1165_v32 = vmul.f32 0.35355338, %v1159_v30  ;;  %v2252_v33 = vpop.f32.mrb[17].mxu1  ;;  %v1729_v30 = vld [vmem:[#allocation3 + $0xc] sm:$0xf] }
 0x1ed   : > { %v1162_v34 = vpop.f32.mrb[18].mxu1 }
 0x1ee   : > { %v2253_v35 = vpop.f32.mrb[19].mxu1  ;;  %v1166_v36 = vadd.f32 %v2836_v31, %v1165_v32  ;;  %v1734_v32 = vsel %vm1183_vm4, %v1729_v30, 0 }
 0x1f0   : > { %v1167_v37 = vsel %vm1118_vm3, %v1166_v36, -inf }
 0x1f1   : > { %1168 = vmax.xlane.f32.xlu0 %v1167_v37 }
 0x1f3   : > { %v1289_v43 = vpop.f32.mrb[20].mxu1 }
 0x1f4   : > { %v2266_v44 = vpop.f32.mrb[21].mxu1  ;;  %v1290_v54 = vadd.f32 %v2077_v51, %v1289_v43 }
 0x1f5   : > { %v1292_v45 = vpop.f32.mrb[22].mxu1 }
 0x1f6   : > { %v2267_v46 = vpop.f32.mrb[23].mxu1  ;;  %v1295_v55 = vpack.c.bf16 %v1290_v54, %v1290_v54 }
 0x27e   : > { %v1169_v38 = vpop.xlane.xlu0 %1168 }
 0x27f   : > { %v1170_v39 = vsub.f32 %v1166_v36, %v1169_v38 }
 0x281   : > { %v1171_v40 = vmul.f32 1.442695, %v1170_v39 }
 0x283   : > { %2414 = vpow2.f32 %v1171_v40 }
 0x28d   : > { %v2415_v41 = vpop.eup %2414 }
 0x28e   : > { %v1173_v42 = vsel %vm1118_vm3, %v2415_v41, 0.0 }
 0x28f   : > { %1174 = vadd.xlane.f32.xlu0 %v1173_v42 }
 0x31c   : > { %v1175_v47 = vpop.xlane.xlu0 %1174 }
 0x31d   : > { %2416 = vrcp.f32 %v1175_v47 }
 0x327   : > { %v2417_v48 = vpop.eup %2416 }
 0x328   : > { %v1177_v49 = vmul.f32 %v2417_v48, %v2415_v41 }
 0x32a   : > { %v1178_v52 = vpack.c.bf16 %v1177_v49, %v1177_v49 }
 0x32c   : > { %2257 = vmatmul.mubr.msk.bf16.vlgmr.msra.gmra.mrb[20].mxu0 %vm1118_vm3, %v1178_v52 }
 0x32d   : > { %2269 = vmatpush3.bf16.xpose.msra.mxu0 %v1302_v53  ;;  %2270 = vmatprep.mubr.msk.bf16.mxu0 %vm2513_vm0, %v2512_v1 }
 0x32e   : > { %2280 = vmatprep.subr.bf16.mxu0 %v2512_v1 }
 0x334   : > { %2271 = vmatmul.mubr.msk.bf16.vlgmr.msra.gmra.mrb[24].mxu0 %vm1118_vm3, %v1295_v55 }
 0x335   : > { %2281 = vmatpush3.bf16.msra.mxu0 %v2408_v56  ;;  %2284 = vmatprep.mubr.msk.bf16.mxu0 %vm2513_vm0, %v2512_v1  ;;  %v1667_v56 = vld [vmem:[#allocation2 + $0xc] sm:$0xf] }
 0x336   : > { %2282 = vmatprep.subr.bf16.mxu0 %v2512_v1 }
 0x339   : > { %2283 = vmatpush3.bf16.msra.mxu0 %v2409_v57  ;;  %v2101_v57 = vld [vmem:[%s2990_s6 + $0x3] ss:$0 sm:$0xff] }
 0x33a   : > { %2294 = vmatprep.subr.bf16.mxu0 %v2512_v1 }
 0x33c   : > { %2285 = vmatmul.mubr.msk.bf16.vlgmr.msra.gmra.mrb[28].mxu0 %vm521_vm1, %v2757_v18 }
 0x33d   : > { %2295 = vmatpush3.bf16.msra.mxu0 %v1549_v59  ;;  %2296 = vmatprep.mubr.msk.bf16.mxu0 %vm2513_vm0, %v2512_v1  ;;  %v1672_v59 = vsel %vm1118_vm3, %v1667_v56, 0 }
 0x33e   : > { %2308 = vmatprep.subr.bf16.mxu0 %v2512_v1 }
 0x3ff   : > { %v1221_v60 = vpop.f32.mrb[20].mxu0 }
 0x400   : > { %v1227_v61 = vpack.c.bf16 %v1221_v60, %v1221_v60  ;;  %v2258_v62 = vpop.f32.mrb[21].mxu0 }
 0x401   : > { %v1224_v63 = vpop.f32.mrb[22].mxu0 }
 0x402   : > { %1229 = vst.msk [vmem:[#allocation4] sm:$0xf] %vm629_vm2, %v1227_v61  ;;  %v2259_v0 = vpop.f32.mrb[23].mxu0 }
 0x407   : > { %v1338_v2 = vpop.f32.mrb[24].mxu0 }
 0x408   : > { %v1344_v3 = vmul.f32 0.35355338, %v1338_v2  ;;  %v2272_v4 = vpop.f32.mrb[25].mxu0 }
 0x409   : > { %v1341_v5 = vpop.f32.mrb[26].mxu0 }
 0x40a   : > { %v2273_v6 = vpop.f32.mrb[27].mxu0  ;;  %v1345_v7 = vadd.f32 %v2836_v31, %v1344_v3 }
 0x40c   : > { %v1346_v8 = vsel %vm1118_vm3, %v1345_v7, -inf }
 0x40d   : > { %1347 = vmax.xlane.f32.xlu1 %v1346_v8 }
 0x40f   : > { %v1474_v14 = vpop.f32.mrb[28].mxu0 }
 0x410   : > { %v2286_v15 = vpop.f32.mrb[29].mxu0  ;;  %v1475_v26 = vadd.f32 %v2089_v23, %v1474_v14  ;;  %v2412_v23 = vld [vmem:[%s2993_s9] sm:$0xff]  }
 0x411   : > { %v1477_v16 = vpop.f32.mrb[30].mxu0 }
 0x412   : > { %v2287_v17 = vpop.f32.mrb[31].mxu0  ;;  %v1480_v27 = vpack.c.bf16 %v1475_v26, %v1475_v26 }
 0x49a   : > { %v1348_v9 = vpop.xlane.xlu1 %1347 }
 0x49b   : > { %v1349_v10 = vsub.f32 %v1345_v7, %v1348_v9 }
 0x49d   : > { %v1350_v11 = vmul.f32 1.442695, %v1349_v10 }
 0x49f   : > { %2418 = vpow2.f32 %v1350_v11 }
 0x4a9   : > { %v2419_v12 = vpop.eup %2418 }
 0x4aa   : > { %v1352_v13 = vsel %vm1118_vm3, %v2419_v12, 0.0 }
 0x4ab   : > { %1353 = vadd.xlane.f32.xlu1 %v1352_v13 }
 0x538   : > { %v1354_v19 = vpop.xlane.xlu1 %1353 }
 0x539   : > { %2420 = vrcp.f32 %v1354_v19 }
 0x543   : > { %v2421_v20 = vpop.eup %2420 }
 0x544   : > { %v1356_v21 = vmul.f32 %v2421_v20, %v2419_v12 }
 0x546   : > { %v1357_v24 = vpack.c.bf16 %v1356_v21, %v1356_v21 }
 0x548   : > { %2277 = vmatmul.mubr.msk.bf16.vlgmr.msra.gmra.mrb[24].mxu1 %vm1118_vm3, %v1357_v24  ;;  %v2413_v24 = vld [vmem:[%s2993_s9 + $0x8] sm:$0xff]  }
 0x549   : > { %2289 = vmatpush3.bf16.xpose.msra.mxu1 %v1487_v25  ;;  %2290 = vmatprep.mubr.msk.bf16.mxu1 %vm2513_vm0, %v2512_v1 }
 0x54a   : > { %2300 = vmatprep.subr.bf16.mxu1 %v2512_v1 }
 0x550   : > { %2291 = vmatmul.mubr.msk.bf16.vlgmr.msra.gmra.mrb[28].mxu1 %vm1118_vm3, %v1480_v27 }
 0x551   : > { %2301 = vmatpush3.bf16.msra.mxu1 %v2410_v28  ;;  %2304 = vmatprep.mubr.msk.bf16.mxu1 %vm2513_vm0, %v2512_v1 }
 0x552   : > { %2302 = vmatprep.subr.bf16.mxu1 %v2512_v1 }
 0x555   : > { %2303 = vmatpush3.bf16.msra.mxu1 %v2411_v29 }
 0x556   : > { %2314 = vmatprep.subr.bf16.mxu1 %v2512_v1 }
 0x558   : > { %2305 = vmatmul.mubr.msk.bf16.vlgmr.msra.gmra.mrb[32].mxu1 %vm521_vm1, %v2757_v18 }
 0x559   : > { %2315 = vmatpush3.bf16.msra.mxu1 %v1734_v32  ;;  %2316 = vmatprep.mubr.msk.bf16.mxu1 %vm2513_vm0, %v2512_v1 }
 0x61b   : > { %v1400_v33 = vpop.f32.mrb[24].mxu1 }
 0x61c   : > { %v2278_v34 = vpop.f32.mrb[25].mxu1  ;;  %v2118_v10 = vpack.c.bf16 %v1400_v33, %v1400_v33  ;;  %v1845_v33 = vunpack.c.l.bf16 %v2757_v18 }
 0x61d   : > { %v1403_v35 = vpop.f32.mrb[26].mxu1 }
 0x61e   : > { %v2279_v36 = vpop.f32.mrb[27].mxu1 }
 0x623   : > { %v1523_v37 = vpop.f32.mrb[28].mxu1 }
 0x624   : > { %v1529_v38 = vmul.f32 0.35355338, %v1523_v37  ;;  %v2292_v39 = vpop.f32.mrb[29].mxu1 }
 0x625   : > { %v1526_v40 = vpop.f32.mrb[30].mxu1 }
 0x626   : > { %v2293_v41 = vpop.f32.mrb[31].mxu1  ;;  %v1530_v42 = vadd.f32 %v2836_v31, %v1529_v38 }
 0x628   : > { %v1531_v43 = vsel %vm1118_vm3, %v1530_v42, -inf }
 0x629   : > { %1532 = vmax.xlane.f32.xlu0 %v1531_v43 }
 0x62b   : > { %v1659_v49 = vpop.f32.mrb[32].mxu1 }
 0x62c   : > { %v2306_v50 = vpop.f32.mrb[33].mxu1  ;;  %v1660_v60 = vadd.f32 %v2101_v57, %v1659_v49  ;;  %v2112_v49 = vld [vmem:[%s2995_s11] ss:$0 sm:$0xff] }
 0x62d   : > { %v1662_v51 = vpop.f32.mrb[34].mxu1 }
 0x62e   : > { %v2307_v52 = vpop.f32.mrb[35].mxu1  ;;  %v1665_v61 = vpack.c.bf16 %v1660_v60, %v1660_v60  ;;  %v2113_v51 = vld [vmem:[%s2996_s12] ss:$0 sm:$0xff] }
 0x6b6   : > { %v1533_v44 = vpop.xlane.xlu0 %1532 }
 0x6b7   : > { %v1534_v45 = vsub.f32 %v1530_v42, %v1533_v44 }
 0x6b9   : > { %v1535_v46 = vmul.f32 1.442695, %v1534_v45 }
 0x6bb   : > { %2422 = vpow2.f32 %v1535_v46 }
 0x6c5   : > { %v2423_v47 = vpop.eup %2422 }
 0x6c6   : > { %v1537_v48 = vsel %vm1118_vm3, %v2423_v47, 0.0 }
 0x6c7   : > { %1538 = vadd.xlane.f32.xlu1 %v1537_v48 }
 0x754   : > { %v1539_v53 = vpop.xlane.xlu1 %1538 }
 0x755   : > { %2424 = vrcp.f32 %v1539_v53 }
 0x75f   : > { %v2425_v54 = vpop.eup %2424 }
 0x760   : > { %v1541_v55 = vmul.f32 %v2425_v54, %v2423_v47 }
 0x762   : > { %v1542_v58 = vpack.c.bf16 %v1541_v55, %v1541_v55 }
 0x764   : > { %2297 = vmatmul.mubr.msk.bf16.vlgmr.msra.gmra.mrb[32].mxu0 %vm1118_vm3, %v1542_v58 }
 0x765   : > { %2309 = vmatpush3.bf16.xpose.msra.mxu0 %v1672_v59  ;;  %2310 = vmatprep.mubr.msk.bf16.mxu0 %vm2513_vm0, %v2512_v1 }
 0x766   : > { %2320 = vmatprep.subr.bf16.mxu0 %v2512_v1 }
 0x76c   : > { %2311 = vmatmul.mubr.msk.bf16.vlgmr.msra.gmra.mrb[36].mxu0 %vm1118_vm3, %v1665_v61 }
 0x76d   : > { %2324 = vmatprep.mubr.msk.bf16.mxu0 %vm2513_vm0, %v2512_v1  ;;  %2321 = vmatpush3.bf16.msra.mxu0 %v2412_v23 }
 0x76e   : > { %2322 = vmatprep.subr.bf16.mxu0 %v2512_v1  ;;  %v2111_v1 = vld [vmem:[%s2994_s10] ss:$0 sm:$0xff] }
 0x771   : > { %2323 = vmatpush3.bf16.msra.mxu0 %v2413_v24 }
 0x837   : > { %v1585_v62 = vpop.f32.mrb[32].mxu0 }
 0x838   : > { %v2298_v63 = vpop.f32.mrb[33].mxu0  ;;  %v2119_v17 = vpack.c.bf16 %v1585_v62, %v1585_v62 }
 0x839   : > { %v1588_v0 = vpop.f32.mrb[34].mxu0 }
 0x83a   : > { %v2299_v2 = vpop.f32.mrb[35].mxu0 }
 0x83f   : > { %v1708_v3 = vpop.f32.mrb[36].mxu0 }
 0x840   : > { %v1714_v4 = vmul.f32 0.35355338, %v1708_v3  ;;  %v2312_v5 = vpop.f32.mrb[37].mxu0 }
 0x841   : > { %v1711_v6 = vpop.f32.mrb[38].mxu0 }
 0x842   : > { %v2313_v7 = vpop.f32.mrb[39].mxu0  ;;  %v1715_v8 = vadd.f32 %v2836_v31, %v1714_v4 }
 0x844   : > { %v1716_v9 = vsel %vm1118_vm3, %v1715_v8, -inf }
 0x845   : > { %1717 = vmax.xlane.f32.xlu0 %v1716_v9 }
 0x85b   : > { %1410 = vrot.lane.b32.xlu0 %v2118_v10, %s2514_s14  ;;  %s475_s14 = sand.u32 1, %s2494_s26  }
 0x85c   : > { %s1889_s16 = scalar_lea.sflag [#allocation6], %s475_s14 }
 0x8d2   : > { %v1718_v11 = vpop.xlane.xlu0 %1717 }
 0x8d3   : > { %v1719_v12 = vsub.f32 %v1715_v8, %v1718_v11 }
 0x8d5   : > { %v1720_v13 = vmul.f32 1.442695, %v1719_v12 }
 0x8d6   : > { %v1411_v14 = vpop.permute.xlu0 %1410 }
 0x8d7   : > { %2426 = vpow2.f32 %v1720_v13  ;;  %1414 = vst.msk [vmem:[#allocation4] sm:$0xf] %vm1413_vm5, %v1411_v14 }
 0x8e1   : > { %v2427_v15 = vpop.eup %2426 }
 0x8e2   : > { %v1722_v16 = vsel %vm1118_vm3, %v2427_v15, 0.0 }
 0x8e3   : > { %1723 = vadd.xlane.f32.xlu1 %v1722_v16 }
 0x8f4   : > { %1595 = vrot.lane.b32.xlu1 %v2119_v17, %s2515_s29  ;;  %s2000_s29 = sshll.u32 %s475_s14, 2 }
 0x8f5   : > { %s477_s23 = scalar_lea.vmem [#allocation5], %s2000_s29 }
 0x8f6   : > { %s1903_s24 = sshll.u32 %s477_s23, 4  ;;  %s2939_s24 = int_to_ptr.vmem [resolvable:$true] %s1903_s24 }
 0x8f7   : > { %s2432_s19 = scalar_lea.vmem %s2939_s24, 64 }
 0x8f8   : > { %p2433_p12 = scmp.ne.s32.totalorder %s2939_s24, %s2432_s19 }
 0x8fa   : > { %p2434_p13 = pnand %p2433_p12, %p2628_p4 }
 0x8fc   : > { %p2435_p0 = pneg %p2434_p13 }
 0x970   : > { %v1724_v31 = vpop.xlane.xlu1 %1723 }
 0x971   : > { %2428 = vrcp.f32 %v1724_v31 }
 0x974   : > { %v1596_v19 = vpop.permute.xlu1 %1595 }
 0x975   : > { %1599 = vst.msk [vmem:[#allocation4] sm:$0xf] %vm1598_vm6, %v1596_v19 }
 0x97b   : > { %v2429_v20 = vpop.eup %2428 }
 0x97c   : > { %v1726_v21 = vmul.f32 %v2429_v20, %v2427_v15 }
 0x97e   : > { %v1727_v22 = vpack.c.bf16 %v1726_v21, %v1726_v21 }
 0x980   : > { %2317 = vmatmul.mubr.msk.bf16.vlgmr.msra.gmra.mrb[36].mxu1 %vm1118_vm3, %v1727_v22 }
 0xa53   : > { %v1770_v25 = vpop.f32.mrb[36].mxu1 }
 0xa54   : > { %v2120_v26 = vpack.c.bf16 %v1770_v25, %v1770_v25  ;;  %v2318_v27 = vpop.f32.mrb[37].mxu1 }
 0xa55   : > { %v1773_v28 = vpop.f32.mrb[38].mxu1 }
 0xa56   : > { %1780 = vrot.lane.b32.xlu1 %v2120_v26, %s2516_s17  ;;  %v2319_v29 = vpop.f32.mrb[39].mxu1  ;;  %s2115_s17 = sshll.u32 %s2502_s28, 6  ;;  %s2517_s28 = smov [#allocation5]  }
 0xa57   : > { %s2937_s2 = scalar_lea.hbm %s2997_s13, %s2115_s17  ;;  %s2436_s29 = sshll.u32 %s2517_s28, 4  ;;  %s2437_s29 = int_to_ptr.vmem [resolvable:$false] %s2436_s29 }
 0xa58   : > { %s2438_s15 = scalar_lea.vmem %s2437_s29, 128  ;;  %p2439_p1 = scmp.lt.s32.totalorder %s2939_s24, %s2437_s29 }
 0xa59   : > { %p2440_p2 = scmp.lt.s32.totalorder %s2438_s15, %s2432_s19 }
 0xa5b   : > { %p2441_p3 = por %p2440_p2, %p2439_p1 }
 0xa5d   : > { %p2442_p5 = pnand %p2441_p3, %p2435_p0 }
 0xac8   : > { %v1781_v30 = vpop.permute.xlu1 %1780 }
 0xac9   : > { %1784 = vst.msk [vmem:[#allocation4] sm:$0xf] %vm1783_vm7, %v1781_v30 }
 0xad0   : > { %v1785_v32 = vld [vmem:[#allocation4] sm:$0xf] }
 0xad1   : > { %2325 = vmatmul.mubr.msk.bf16.vlgmr.msra.gmra.mrb[40].mxu0 %vm521_vm1, %v1785_v32 }
 0xba4   : > { %v1839_v34 = vpop.f32.mrb[40].mxu0 }
 0xba5   : > { %v1846_v35 = vadd.f32 %v1845_v33, %v1839_v34  ;;  %v2326_v36 = vpop.f32.mrb[41].mxu0 }
 0xba6   : > { %v1842_v37 = vpop.f32.mrb[42].mxu0 }
 0xba7   : > { %v2327_v38 = vpop.f32.mrb[43].mxu0  ;;  %v1854_v39 = vadd.f32 %v2111_v1, %v1846_v35 }
 0xba9   : > { %v1855_v40 = vsel %vm521_vm1, %v1854_v39, 0.0 }
 0xbaa   : > { %1856 = vadd.xlane.f32.xlu1 %v1855_v40 }
 0xc37   : > { %v1857_v41 = vpop.xlane.xlu1 %1856 }
 0xc38   : > { %v1859_v42 = vmul.f32 0.03125, %v1857_v41 }
 0xc3a   : > { %v1860_v43 = vsub.f32 %v1854_v39, %v1859_v42 }
 0xc3c   : > { %v1861_v44 = vmul.f32 %v1860_v43, %v1860_v43 }
 0xc3e   : > { %v1862_v18 = vsel %vm521_vm1, %v1861_v44, 0.0 }
 0xc3f   : > { %1863 = vadd.xlane.f32.xlu0 %v1862_v18 }
 0xccc   : > { %v1864_v45 = vpop.xlane.xlu0 %1863 }
 0xccd   : > { %v1865_v46 = vmul.f32 0.03125, %v1864_v45 }
 0xccf   : > { %v1866_v47 = vadd.f32 1e-12, %v1865_v46 }
 0xcd1   : > { %2430 = vrsqrt.f32 %v1866_v47 }
 0xcdb   : > { %v2431_v48 = vpop.eup %2430 }
 0xcdc   : > { %v1868_v50 = vmul.f32 %v2431_v48, %v1860_v43 }
 0xcde   : > { %v1876_v52 = vmul.f32 %v2112_v49, %v1868_v50 }
 0xce0   : > { %v1884_v53 = vadd.f32 %v2113_v51, %v1876_v52 }
 0xce2   : > { %v1885_v54 = vpack.c.bf16 %v1884_v53, %v1884_v53 }
 0xce4   : > { %1887 = vst.msk [vmem:[%s477_s23] sm:$0xf] %vm1886_vm8, %v1885_v54 }
 0xce5   : > { %2445 = shalt.err (!%p2442_p5)
}
 0xce6   : > { %s2446_s0 = scalar_lea.hbm %s2937_s2, 64  ;;  %s2450_s22 = scalar_lea.hbm %s2997_s13, 128 }
 0xce7   : > { %p2447_p6 = scmp.ne.s32.totalorder %s2937_s2, %s2446_s0  ;;  %p2451_p10 = scmp.lt.u32.totalorder %s2937_s2, %s2997_s13 }
 0xce8   : > { %p2452_p11 = scmp.lt.u32.totalorder %s2450_s22, %s2446_s0  ;;  %p2454_p13 = scmp.lt.u32.totalorder %s2446_s0, %s2937_s2 }
 0xce9   : > { %p2448_p7 = pnand %p2447_p6, %p2628_p4 }
 0xcea   : > { %p2453_p12 = por %p2452_p11, %p2451_p10 }
 0xceb   : > { %p2449_p9 = pneg %p2448_p7 }
 0xcec   : > { %p2455_p0 = por %p2454_p13, %p2453_p12 }
 0xcee   : > { %p2456_p1 = pnand %p2455_p0, %p2449_p9 }
 0xcf0   : > { %2459 = shalt.err (!%p2456_p1)
}
 0xcf1   : > { %2328 = dma.vmem_to_hbm [thread:$0]  (%p2628_p4), %s2939_s24, 64, %s2937_s2, %s1889_s16  }
 0xcf2 PF: > { %p2334_p2 = scmp.ge.s32.totalorder %s2510_s30, 2  ;;  %s1915_s19 = sand.u32 1, %s2490_s25  }
 0xcf3   : > { %s1916_s28 = scalar_lea.sflag [#allocation6], %s1915_s19 }
 0xcf4   : > { %p2331_p3 = pnand %p2334_p2, %p2635_p8 }
 0xcf6   : > { %2485 = dma.done.wait (!%p2331_p3), %s1916_s28, 64  }
 0xcf7   : > { %2487 = vsyncadd (!%p2331_p3), %s1916_s28, 4294967232  ;;  %s26_s30 = sadd.s32 1, %s2510_s30   ;;  %s3012_s28 = sld [smem:[#allocation8_spill]] }
 0xcf8   : > { %p23_p5 = scmp.ge.s32.totalorder %s26_s30, 4   ;;  %s3013_s29 = sld [smem:[#allocation9_spill]] }
 0xcf9   : > { %s3014_s25 = smov %s2494_s26  ;;  %s3015_s26 = smov %s2498_s27 }
 0xcfa   : > { %s3016_s27 = smov %s2641_s21  ;;  %25 = sbr.rel (!%p23_p5) target bundleno = 8 (0x8), region = 147 }
 0xd01   :  { %1921 = vsyncpa [#allocation6], 1 }
 0xd02   :  { %1923 = vsyncpa [#allocation6 + $0x1], 1 }

</bundles_post_ra>
